<compile_context>
chip_gen: v7x
topology: tpu7x:2x2x1
jax: 0.10.0
libtpu: 0.0.40
codegen_flags: <defaults>
</compile_context>

<pallas_src>
import math

import jax
import jax.numpy as jnp
from jax.experimental import pallas as pl
from jax.experimental.pallas import tpu as pltpu


def _round_up(v, m):
    return ((v + m - 1) // m) * m


def _const_spec(shape):
    """BlockSpec for invariant (weight) operands: constant block index, and
    single-buffered (they are never re-fetched across grid steps)."""
    nd = len(shape)
    index_map = lambda i, _nd=nd: (0,) * _nd
    if hasattr(pl, "Buffered"):
        try:
            return pl.BlockSpec(shape, index_map, pipeline_mode=pl.Buffered(1))
        except TypeError:  # older jax without pipeline_mode kwarg
            pass
    return pl.BlockSpec(shape, index_map)


# row indices inside the bundled [16, D] f32 constants array
ROW_H0, ROW_VC, ROW_SCLS = 0, 1, 2
ROW_PRE_G, ROW_PRE_B = 3, 4
ROW_LN1_G, ROW_LN1_B = 5, 6
ROW_LN2_G, ROW_LN2_B = 7, 8
ROW_BV, ROW_BO, ROW_B2 = 9, 10, 11


# --------------------------------------------------------------------------- #
# fused encoder kernel: one batch block (Bb images) per grid step
# --------------------------------------------------------------------------- #
def _encoder_kernel(patches_ref, w_pe_ref, b_pe_ref, pos_ref, consts_ref,
                    wkq_ref, wv_ref, wo_ref, w1_ref, b1_ref, w2_ref,
                    wp_ref, bp_ref, o_ref):
    Bb, N, CPP = patches_ref.shape
    D = pos_ref.shape[-1]

    c = consts_ref[...]                                    # [16, D] f32

    def row(i):
        return c[i:i + 1, :]                               # [1, D] f32

    def ln(x, g, b):                                       # f32 LayerNorm (VPU/EUP)
        m = jnp.mean(x, axis=-1, keepdims=True)
        v = jnp.mean(jnp.square(x - m), axis=-1, keepdims=True)
        return (x - m) * jax.lax.rsqrt(v + 1e-5) * g + b

    def mm(a, b):                                          # bf16 MXU, f32 accumulate
        return jnp.dot(a.astype(jnp.bfloat16), b.astype(jnp.bfloat16),
                       preferred_element_type=jnp.float32)

    # ---- patch embedding (pixel normalization folded into w_pe / b_pe) -----
    p2 = patches_ref[...].reshape(Bb * N, CPP)
    emb = mm(p2, w_pe_ref[...]) + b_pe_ref[...]            # [Bb*N, D] f32

    # ---- + positional embedding + CLIP pre_layrnorm (patch tokens only) ----
    h = emb.reshape(Bb, N, D) + pos_ref[...]
    h = ln(h, row(ROW_PRE_G), row(ROW_PRE_B))              # [Bb, N, D]

    # ---- encoder layer: CLS row is the only query ---------------------------
    # TODO(synk): real CLIP ViT-L/14 is 24 layers x 16 heads; this single
    # synthetic single-head pre-LN layer makes the CLS-only query/MLP exact
    # for last_hidden_state[:, 0] (valid only while the backbone is 1 layer).
    x = ln(h, row(ROW_LN1_G), row(ROW_LN1_B))              # [Bb, N, D]
    x2 = x.reshape(Bb * N, D)
    v = (mm(x2, wv_ref[...]) + row(ROW_BV)).reshape(Bb, N, D)

    # CLS-query scores: q0.k_n == x_n @ (wk @ q0); softmax scale and the k-bias
    # shift are folded into wkq / s_cls on the host side (softmax is shift
    # invariant) -> no K projection, no k transpose in the kernel.
    s = mm(x2, wkq_ref[...])[:, 0:1].reshape(Bb, N, 1)     # [Bb, N, 1] f32
    s_cls = c[ROW_SCLS:ROW_SCLS + 1, 0:1]                  # [1, 1] f32

    m = jnp.maximum(jnp.max(s, axis=1, keepdims=True), s_cls)   # [Bb, 1, 1]
    p = jnp.exp(s - m)                                     # [Bb, N, 1]
    p_cls = jnp.exp(s_cls - m)                             # [Bb, 1, 1]
    denom = jnp.sum(p, axis=1, keepdims=True) + p_cls      # [Bb, 1, 1]
    ctx = jnp.sum(p * v, axis=1)                           # [Bb, D]
    ctx = ctx + p_cls.reshape(Bb, 1) * row(ROW_VC)
    ctx = ctx * pl.reciprocal(denom.reshape(Bb, 1), approx=True)

    attn = mm(ctx, wo_ref[...]) + row(ROW_BO)              # [Bb, D]
    h0 = row(ROW_H0) + attn                                # CLS residual base

    # ---- MLP with quick-GELU (CLIP activation) on the CLS rows --------------
    y = ln(h0, row(ROW_LN2_G), row(ROW_LN2_B))
    y = mm(y, w1_ref[...]) + b1_ref[...]                   # [Bb, MLP]
    y = y * jax.nn.sigmoid(1.702 * y)
    y = mm(y, w2_ref[...]) + row(ROW_B2)                   # [Bb, D]
    h0 = h0 + y

    # ---- fused projection head = nn.Linear(feature_dim, output_dim) ---------
    o_ref[...] = mm(h0, wp_ref[...]) + bp_ref[...]         # [Bb, OUTp] f32


# --------------------------------------------------------------------------- #
# one-time (outside the per-call path) frozen-weight preparation
# --------------------------------------------------------------------------- #
def prepare_params(params, patch):
    clip_mean = jnp.array([0.48145466, 0.4578275, 0.40821073], jnp.float32)
    clip_std = jnp.array([0.26862954, 0.26130258, 0.27577711], jnp.float32)
    scale_c = 0.5 / clip_std                                 # ((img+1)/2 - mean)/std
    shift_c = (0.5 - clip_mean) / clip_std

    f32 = lambda a: a.astype(jnp.float32)
    r1 = lambda a: f32(a).reshape(1, -1)

    w_pe = f32(params['w_pe'])                               # [C*P*P, D]
    D = w_pe.shape[1]
    scale_rows = jnp.repeat(scale_c, patch * patch)[:, None]
    shift_rows = jnp.repeat(shift_c, patch * patch)[:, None]
    w_fold = (w_pe * scale_rows).astype(jnp.bfloat16)        # exact algebraic fold
    b_fold = (r1(params['b_pe'])
              + jnp.sum(w_pe * shift_rows, axis=0, keepdims=True))

    pos = f32(params['pos_emb'])                             # [S, D]
    pos_patch = pos[1:]

    def ln(x, g, b):
        m = jnp.mean(x, axis=-1, keepdims=True)
        v = jnp.mean(jnp.square(x - m), axis=-1, keepdims=True)
        return (x - m) * jax.lax.rsqrt(v + 1e-5) * g + b

    pre_g, pre_b = r1(params['pre_g']), r1(params['pre_b'])
    ln1_g, ln1_b = r1(params['ln1_g']), r1(params['ln1_b'])
    ln2_g, ln2_b = r1(params['ln2_g']), r1(params['ln2_b'])
    bq, bk, bv, bo = (r1(params['bq']), r1(params['bk']),
                      r1(params['bv']), r1(params['bo']))

    # CLS token path is input independent (frozen params, per-row LayerNorm):
    cls_pre = r1(params['cls_emb']) + pos[0:1]
    h0_base = ln(cls_pre, pre_g, pre_b)                      # CLS residual base
    x0 = ln(h0_base, ln1_g, ln1_b)
    q0 = x0 @ f32(params['wq']) + bq                         # [1, D]
    k_cls = x0 @ f32(params['wk']) + bk
    v_cls = x0 @ f32(params['wv']) + bv

    scale = 1.0 / math.sqrt(D)
    wkq = (f32(params['wk']) @ q0.reshape(D, 1)) * scale     # [D, 1]
    wkq_pad = (jnp.zeros((D, 128), jnp.float32)
               .at[:, 0:1].set(wkq).astype(jnp.bfloat16))    # lane-padded rhs
    s_cls = scale * jnp.sum(q0 * (k_cls - bk))               # bias shift folded

    OUT = params['w_proj'].shape[1]
    OUTp = _round_up(OUT, 128)
    w_proj = (jnp.zeros((D, OUTp), jnp.float32)
              .at[:, :OUT].set(f32(params['w_proj'])).astype(jnp.bfloat16))
    b_proj = (jnp.zeros((1, OUTp), jnp.float32)
              .at[:, :OUT].set(f32(params['b_proj']).reshape(1, OUT)))

    consts = jnp.zeros((16, D), jnp.float32)
    for r, val in ((ROW_H0, h0_base), (ROW_VC, v_cls),
                   (ROW_SCLS, jnp.full((1, D), s_cls, jnp.float32)),
                   (ROW_PRE_G, pre_g), (ROW_PRE_B, pre_b),
                   (ROW_LN1_G, ln1_g), (ROW_LN1_B, ln1_b),
                   (ROW_LN2_G, ln2_g), (ROW_LN2_B, ln2_b),
                   (ROW_BV, bv), (ROW_BO, bo), (ROW_B2, r1(params['b2']))):
        consts = consts.at[r:r + 1, :].set(val)

    return dict(
        w_pe=w_fold, b_pe=b_fold, pos=pos_patch, consts=consts,
        wkq=wkq_pad,
        wv=params['wv'].astype(jnp.bfloat16),
        wo=params['wo'].astype(jnp.bfloat16),
        w1=params['w1'].astype(jnp.bfloat16),
        b1=r1(params['b1']),
        w2=params['w2'].astype(jnp.bfloat16),
        w_proj=w_proj, b_proj=b_proj,
    )


# --------------------------------------------------------------------------- #
# forward pass (mirrors SimplifiedClothEncoder.forward)
# --------------------------------------------------------------------------- #
def simplified_cloth_encoder_forward(x, prep, *, patch, out_dim, block_b=8):
    B, C, H, W = x.shape
    D = prep['pos'].shape[-1]
    gh, gw = H // patch, W // patch
    N = gh * gw
    CPP = C * patch * patch
    MLP = prep['w1'].shape[1]
    OUTp = prep['w_proj'].shape[1]

    # TODO(synk): CLIPImageProcessor's PIL resize + center-crop to 224x224 is
    # not reproduced; inputs are assumed to already be at patch-grid resolution.
    patches = x.reshape(B, C, gh, patch, gw, patch)
    patches = patches.transpose(0, 2, 4, 1, 3, 5).reshape(B, N, CPP)

    # batch block (>=8 rows -> sublane-dense stores; at real batch sizes pick
    # block_b so B/block_b >= 2 to keep both v7x TensorCores busy)
    Bb = block_b
    Bp = _round_up(B, Bb)
    if Bp != B:
        patches = jnp.pad(patches, ((0, Bp - B), (0, 0), (0, 0)))

    in_specs = [
        pl.BlockSpec((Bb, N, CPP), lambda i: (i, 0, 0)),     # per-step batch block
        _const_spec((CPP, D)),                               # w_pe (folded, bf16)
        _const_spec((1, D)),                                 # b_pe (folded, f32)
        _const_spec((N, D)),                                 # pos emb (patch rows)
        _const_spec((16, D)),                                # bundled f32 constants
        _const_spec((D, 128)),                               # wk @ q0 (scaled, bf16)
        _const_spec((D, D)),                                 # wv
        _const_spec((D, D)),                                 # wo
        _const_spec((D, MLP)),                               # w1
        _const_spec((1, MLP)),                               # b1
        _const_spec((MLP, D)),                               # w2
        _const_spec((D, OUTp)),                              # w_proj (padded)
        _const_spec((1, OUTp)),                              # b_proj (padded)
    ]

    out = pl.pallas_call(
        _encoder_kernel,
        out_shape=jax.ShapeDtypeStruct((Bp, OUTp), jnp.float32),
        grid=(Bp // Bb,),
        in_specs=in_specs,
        out_specs=pl.BlockSpec((Bb, OUTp), lambda i: (i, 0)),
        compiler_params=pltpu.CompilerParams(
            dimension_semantics=("parallel",),
            # above the default scoped limit on v5e/v6e, within v7x's 64 MiB
            vmem_limit_bytes=64 * 1024 * 1024),
    )(patches, prep['w_pe'], prep['b_pe'], prep['pos'], prep['consts'],
      prep['wkq'], prep['wv'], prep['wo'], prep['w1'], prep['b1'],
      prep['w2'], prep['w_proj'], prep['b_proj'])

    return out[:B, :out_dim]


# --------------------------------------------------------------------------- #
if __name__ == "__main__":
    # small synthetic shapes
    B, C, H, W = 2, 3, 32, 32          # cloth_images: [B, 3, H, W] in [-1, 1]
    P = 8                              # patch size
    D = 64                             # backbone hidden size (stand-in for 1024)
    MLP = 4 * D
    OUT = 32                           # output_dim (stand-in for 768)
    N = (H // P) * (W // P)
    S = N + 1

    key = jax.random.PRNGKey(0)
    ks = jax.random.split(key, 12)

    def init(k, shape, s=0.02):
        return s * jax.random.normal(k, shape, jnp.float32)

    params = dict(
        # patch embedding (conv) weights, flattened to [C*P*P, D]
        w_pe=init(ks[0], (C * P * P, D)),
        b_pe=jnp.zeros((D,), jnp.float32),
        cls_emb=init(ks[1], (D,)),
        pos_emb=init(ks[2], (S, D)),
        pre_g=jnp.ones((1, D), jnp.float32), pre_b=jnp.zeros((1, D), jnp.float32),
        ln1_g=jnp.ones((1, D), jnp.float32), ln1_b=jnp.zeros((1, D), jnp.float32),
        wq=init(ks[3], (D, D)), bq=jnp.zeros((1, D), jnp.float32),
        wk=init(ks[4], (D, D)), bk=jnp.zeros((1, D), jnp.float32),
        wv=init(ks[5], (D, D)), bv=jnp.zeros((1, D), jnp.float32),
        wo=init(ks[6], (D, D)), bo=jnp.zeros((1, D), jnp.float32),
        ln2_g=jnp.ones((1, D), jnp.float32), ln2_b=jnp.zeros((1, D), jnp.float32),
        w1=init(ks[7], (D, MLP)), b1=jnp.zeros((1, MLP), jnp.float32),
        w2=init(ks[8], (MLP, D)), b2=jnp.zeros((1, D), jnp.float32),
        # projection = nn.Linear(feature_dim, output_dim)
        w_proj=init(ks[9], (D, OUT)),
        b_proj=jnp.zeros((OUT,), jnp.float32),
    )

    cloth_images = jax.random.uniform(ks[10], (B, C, H, W), jnp.float32,
                                      minval=-1.0, maxval=1.0)

    # frozen-weight preparation hoisted out of the per-call path
    prep = prepare_params(params, P)

    fwd = jax.jit(simplified_cloth_encoder_forward,
                  static_argnames=("patch", "out_dim", "block_b"))
    out = fwd(cloth_images, prep, patch=P, out_dim=OUT)
    out = jax.block_until_ready(out)
    assert out.shape == (B, OUT) and out.dtype == jnp.float32
    assert bool(jnp.all(jnp.isfinite(out)))
    print("KERNEL_OK")
</pallas_src>

<mosaic_0001>
module attributes {stable_mosaic.version = 11 : i64} {
  func.func @_encoder_kernel(%arg0: i32, %arg1: memref<8x16x192xf32, #tpu.memory_space<vmem>>, %arg2: memref<192x64xbf16, #tpu.memory_space<vmem>>, %arg3: memref<1x64xf32, #tpu.memory_space<vmem>>, %arg4: memref<16x64xf32, #tpu.memory_space<vmem>>, %arg5: memref<16x64xf32, #tpu.memory_space<vmem>>, %arg6: memref<64x128xbf16, #tpu.memory_space<vmem>>, %arg7: memref<64x64xbf16, #tpu.memory_space<vmem>>, %arg8: memref<64x64xbf16, #tpu.memory_space<vmem>>, %arg9: memref<64x256xbf16, #tpu.memory_space<vmem>>, %arg10: memref<1x256xf32, #tpu.memory_space<vmem>>, %arg11: memref<256x64xbf16, #tpu.memory_space<vmem>>, %arg12: memref<64x128xbf16, #tpu.memory_space<vmem>>, %arg13: memref<1x128xf32, #tpu.memory_space<vmem>>, %arg14: memref<8x128xf32, #tpu.memory_space<vmem>>) attributes {dimension_semantics = [#tpu.dimension_semantics<parallel>], iteration_bounds = array<i64: 1>, scalar_prefetch = 0 : i64, scratch_operands = 0 : i64, tpu.core_type = #tpu.core_type<tc>, window_params = [{transform_indices = @transform_0, window_bounds = array<i64: 8, 16, 192>}, {pipeline_mode = #tpu.pipeline_mode<synchronous>, transform_indices = @transform_1, window_bounds = array<i64: 192, 64>}, {pipeline_mode = #tpu.pipeline_mode<synchronous>, transform_indices = @transform_2, window_bounds = array<i64: 1, 64>}, {pipeline_mode = #tpu.pipeline_mode<synchronous>, transform_indices = @transform_3, window_bounds = array<i64: 16, 64>}, {pipeline_mode = #tpu.pipeline_mode<synchronous>, transform_indices = @transform_4, window_bounds = array<i64: 16, 64>}, {pipeline_mode = #tpu.pipeline_mode<synchronous>, transform_indices = @transform_5, window_bounds = array<i64: 64, 128>}, {pipeline_mode = #tpu.pipeline_mode<synchronous>, transform_indices = @transform_6, window_bounds = array<i64: 64, 64>}, {pipeline_mode = #tpu.pipeline_mode<synchronous>, transform_indices = @transform_7, window_bounds = array<i64: 64, 64>}, {pipeline_mode = #tpu.pipeline_mode<synchronous>, transform_indices = @transform_8, window_bounds = array<i64: 64, 256>}, {pipeline_mode = #tpu.pipeline_mode<synchronous>, transform_indices = @transform_9, window_bounds = array<i64: 1, 256>}, {pipeline_mode = #tpu.pipeline_mode<synchronous>, transform_indices = @transform_10, window_bounds = array<i64: 256, 64>}, {pipeline_mode = #tpu.pipeline_mode<synchronous>, transform_indices = @transform_11, window_bounds = array<i64: 64, 128>}, {pipeline_mode = #tpu.pipeline_mode<synchronous>, transform_indices = @transform_12, window_bounds = array<i64: 1, 128>}, {transform_indices = @transform_13, window_bounds = array<i64: 8, 128>}]} {
    %c0 = arith.constant 0 : index
    %c0_0 = arith.constant 0 : index
    %0 = vector.load %arg5[%c0, %c0_0] : memref<16x64xf32, #tpu.memory_space<vmem>>, vector<16x64xf32>
    %c0_1 = arith.constant 0 : index
    %c0_2 = arith.constant 0 : index
    %c0_3 = arith.constant 0 : index
    %1 = vector.load %arg1[%c0_1, %c0_2, %c0_3] : memref<8x16x192xf32, #tpu.memory_space<vmem>>, vector<8x16x192xf32>
    %2 = vector.shape_cast %1 : vector<8x16x192xf32> to vector<128x192xf32>
    %c0_4 = arith.constant 0 : index
    %c0_5 = arith.constant 0 : index
    %3 = vector.load %arg2[%c0_4, %c0_5] : memref<192x64xbf16, #tpu.memory_space<vmem>>, vector<192x64xbf16>
    %4 = arith.truncf %2 : vector<128x192xf32> to vector<128x192xbf16>
    %cst = arith.constant dense<0.000000e+00> : vector<128x64xf32>
    %5 = tpu.matmul %4, %3, %cst {dimension_numbers = #tpu.dot_dimension_numbers<[1], [0], [0], [1], [0, 0, 1, 1], [], []>} : vector<128x192xbf16>, vector<192x64xbf16>, vector<128x64xf32> -> vector<128x64xf32>
    %c0_6 = arith.constant 0 : index
    %c0_7 = arith.constant 0 : index
    %6 = vector.load %arg3[%c0_6, %c0_7] : memref<1x64xf32, #tpu.memory_space<vmem>>, vector<1x64xf32>
    %7 = vector.broadcast %6 : vector<1x64xf32> to vector<128x64xf32>
    %8 = arith.addf %5, %7 : vector<128x64xf32>
    %9 = vector.shape_cast %8 : vector<128x64xf32> to vector<8x16x64xf32>
    %c0_8 = arith.constant 0 : index
    %c0_9 = arith.constant 0 : index
    %10 = vector.load %arg4[%c0_8, %c0_9] : memref<16x64xf32, #tpu.memory_space<vmem>>, vector<16x64xf32>
    %11 = vector.shape_cast %10 : vector<16x64xf32> to vector<1x16x64xf32>
    %12 = vector.broadcast %11 : vector<1x16x64xf32> to vector<8x16x64xf32>
    %13 = arith.addf %9, %12 : vector<8x16x64xf32>
    %14 = vector.extract_strided_slice %0 {offsets = [3, 0], sizes = [1, 64], strides = [1, 1]} : vector<16x64xf32> to vector<1x64xf32>
    %15 = vector.extract_strided_slice %0 {offsets = [4, 0], sizes = [1, 64], strides = [1, 1]} : vector<16x64xf32> to vector<1x64xf32>
    %cst_10 = arith.constant dense<0.000000e+00> : vector<8x16xf32>
    %16 = vector.multi_reduction <add>, %13, %cst_10 [2] : vector<8x16x64xf32> to vector<8x16xf32>
    %17 = vector.shape_cast %16 : vector<8x16xf32> to vector<8x16x1xf32>
    %cst_11 = arith.constant 6.400000e+01 : f32
    %18 = vector.broadcast %cst_11 : f32 to vector<8x16x1xf32>
    %19 = arith.divf %17, %18 : vector<8x16x1xf32>
    %20 = vector.broadcast %19 : vector<8x16x1xf32> to vector<8x16x64xf32>
    %21 = arith.subf %13, %20 : vector<8x16x64xf32>
    %22 = arith.mulf %21, %21 : vector<8x16x64xf32>
    %cst_12 = arith.constant dense<0.000000e+00> : vector<8x16xf32>
    %23 = vector.multi_reduction <add>, %22, %cst_12 [2] : vector<8x16x64xf32> to vector<8x16xf32>
    %24 = vector.shape_cast %23 : vector<8x16xf32> to vector<8x16x1xf32>
    %cst_13 = arith.constant 6.400000e+01 : f32
    %25 = vector.broadcast %cst_13 : f32 to vector<8x16x1xf32>
    %26 = arith.divf %24, %25 : vector<8x16x1xf32>
    %27 = vector.broadcast %19 : vector<8x16x1xf32> to vector<8x16x64xf32>
    %28 = arith.subf %13, %27 : vector<8x16x64xf32>
    %cst_14 = arith.constant 9.99999974E-6 : f32
    %29 = vector.broadcast %cst_14 : f32 to vector<8x16x1xf32>
    %30 = arith.addf %26, %29 : vector<8x16x1xf32>
    %31 = math.rsqrt %30 : vector<8x16x1xf32>
    %32 = vector.broadcast %31 : vector<8x16x1xf32> to vector<8x16x64xf32>
    %33 = arith.mulf %28, %32 : vector<8x16x64xf32>
    %34 = vector.shape_cast %14 : vector<1x64xf32> to vector<1x1x64xf32>
    %35 = vector.broadcast %34 : vector<1x1x64xf32> to vector<8x16x64xf32>
    %36 = arith.mulf %33, %35 : vector<8x16x64xf32>
    %37 = vector.shape_cast %15 : vector<1x64xf32> to vector<1x1x64xf32>
    %38 = vector.broadcast %37 : vector<1x1x64xf32> to vector<8x16x64xf32>
    %39 = arith.addf %36, %38 : vector<8x16x64xf32>
    %40 = vector.extract_strided_slice %0 {offsets = [5, 0], sizes = [1, 64], strides = [1, 1]} : vector<16x64xf32> to vector<1x64xf32>
    %41 = vector.extract_strided_slice %0 {offsets = [6, 0], sizes = [1, 64], strides = [1, 1]} : vector<16x64xf32> to vector<1x64xf32>
    %cst_15 = arith.constant dense<0.000000e+00> : vector<8x16xf32>
    %42 = vector.multi_reduction <add>, %39, %cst_15 [2] : vector<8x16x64xf32> to vector<8x16xf32>
    %43 = vector.shape_cast %42 : vector<8x16xf32> to vector<8x16x1xf32>
    %cst_16 = arith.constant 6.400000e+01 : f32
    %44 = vector.broadcast %cst_16 : f32 to vector<8x16x1xf32>
    %45 = arith.divf %43, %44 : vector<8x16x1xf32>
    %46 = vector.broadcast %45 : vector<8x16x1xf32> to vector<8x16x64xf32>
    %47 = arith.subf %39, %46 : vector<8x16x64xf32>
    %48 = arith.mulf %47, %47 : vector<8x16x64xf32>
    %cst_17 = arith.constant dense<0.000000e+00> : vector<8x16xf32>
    %49 = vector.multi_reduction <add>, %48, %cst_17 [2] : vector<8x16x64xf32> to vector<8x16xf32>
    %50 = vector.shape_cast %49 : vector<8x16xf32> to vector<8x16x1xf32>
    %cst_18 = arith.constant 6.400000e+01 : f32
    %51 = vector.broadcast %cst_18 : f32 to vector<8x16x1xf32>
    %52 = arith.divf %50, %51 : vector<8x16x1xf32>
    %53 = vector.broadcast %45 : vector<8x16x1xf32> to vector<8x16x64xf32>
    %54 = arith.subf %39, %53 : vector<8x16x64xf32>
    %cst_19 = arith.constant 9.99999974E-6 : f32
    %55 = vector.broadcast %cst_19 : f32 to vector<8x16x1xf32>
    %56 = arith.addf %52, %55 : vector<8x16x1xf32>
    %57 = math.rsqrt %56 : vector<8x16x1xf32>
    %58 = vector.broadcast %57 : vector<8x16x1xf32> to vector<8x16x64xf32>
    %59 = arith.mulf %54, %58 : vector<8x16x64xf32>
    %60 = vector.shape_cast %40 : vector<1x64xf32> to vector<1x1x64xf32>
    %61 = vector.broadcast %60 : vector<1x1x64xf32> to vector<8x16x64xf32>
    %62 = arith.mulf %59, %61 : vector<8x16x64xf32>
    %63 = vector.shape_cast %41 : vector<1x64xf32> to vector<1x1x64xf32>
    %64 = vector.broadcast %63 : vector<1x1x64xf32> to vector<8x16x64xf32>
    %65 = arith.addf %62, %64 : vector<8x16x64xf32>
    %66 = vector.shape_cast %65 : vector<8x16x64xf32> to vector<128x64xf32>
    %c0_20 = arith.constant 0 : index
    %c0_21 = arith.constant 0 : index
    %67 = vector.load %arg7[%c0_20, %c0_21] : memref<64x64xbf16, #tpu.memory_space<vmem>>, vector<64x64xbf16>
    %68 = arith.truncf %66 : vector<128x64xf32> to vector<128x64xbf16>
    %cst_22 = arith.constant dense<0.000000e+00> : vector<128x64xf32>
    %69 = tpu.matmul %68, %67, %cst_22 {dimension_numbers = #tpu.dot_dimension_numbers<[1], [0], [0], [1], [0, 0, 1, 1], [], []>} : vector<128x64xbf16>, vector<64x64xbf16>, vector<128x64xf32> -> vector<128x64xf32>
    %70 = vector.extract_strided_slice %0 {offsets = [9, 0], sizes = [1, 64], strides = [1, 1]} : vector<16x64xf32> to vector<1x64xf32>
    %71 = vector.broadcast %70 : vector<1x64xf32> to vector<128x64xf32>
    %72 = arith.addf %69, %71 : vector<128x64xf32>
    %73 = vector.shape_cast %72 : vector<128x64xf32> to vector<8x16x64xf32>
    %c0_23 = arith.constant 0 : index
    %c0_24 = arith.constant 0 : index
    %74 = vector.load %arg6[%c0_23, %c0_24] : memref<64x128xbf16, #tpu.memory_space<vmem>>, vector<64x128xbf16>
    %75 = arith.truncf %66 : vector<128x64xf32> to vector<128x64xbf16>
    %cst_25 = arith.constant dense<0.000000e+00> : vector<128x128xf32>
    %76 = tpu.matmul %75, %74, %cst_25 {dimension_numbers = #tpu.dot_dimension_numbers<[1], [0], [0], [1], [0, 0, 1, 1], [], []>} : vector<128x64xbf16>, vector<64x128xbf16>, vector<128x128xf32> -> vector<128x128xf32>
    %77 = vector.extract_strided_slice %76 {offsets = [0, 0], sizes = [128, 1], strides = [1, 1]} : vector<128x128xf32> to vector<128x1xf32>
    %78 = vector.shape_cast %77 : vector<128x1xf32> to vector<8x16x1xf32>
    %79 = vector.extract_strided_slice %0 {offsets = [2, 0], sizes = [1, 1], strides = [1, 1]} : vector<16x64xf32> to vector<1x1xf32>
    %cst_26 = arith.constant dense<0xFF800000> : vector<8x1xf32>
    %80 = vector.multi_reduction <maximumf>, %78, %cst_26 [1] : vector<8x16x1xf32> to vector<8x1xf32>
    %81 = vector.shape_cast %80 : vector<8x1xf32> to vector<8x1x1xf32>
    %82 = vector.shape_cast %79 : vector<1x1xf32> to vector<1x1x1xf32>
    %83 = vector.broadcast %82 : vector<1x1x1xf32> to vector<8x1x1xf32>
    %84 = arith.maximumf %81, %83 : vector<8x1x1xf32>
    %85 = vector.broadcast %84 : vector<8x1x1xf32> to vector<8x16x1xf32>
    %86 = arith.subf %78, %85 : vector<8x16x1xf32>
    %87 = math.exp %86 : vector<8x16x1xf32>
    %88 = vector.shape_cast %79 : vector<1x1xf32> to vector<1x1x1xf32>
    %89 = vector.broadcast %88 : vector<1x1x1xf32> to vector<8x1x1xf32>
    %90 = arith.subf %89, %84 : vector<8x1x1xf32>
    %91 = math.exp %90 : vector<8x1x1xf32>
    %cst_27 = arith.constant dense<0.000000e+00> : vector<8x1xf32>
    %92 = vector.multi_reduction <add>, %87, %cst_27 [1] : vector<8x16x1xf32> to vector<8x1xf32>
    %93 = vector.shape_cast %92 : vector<8x1xf32> to vector<8x1x1xf32>
    %94 = arith.addf %93, %91 : vector<8x1x1xf32>
    %95 = vector.broadcast %87 : vector<8x16x1xf32> to vector<8x16x64xf32>
    %96 = arith.mulf %95, %73 : vector<8x16x64xf32>
    %cst_28 = arith.constant dense<0.000000e+00> : vector<8x64xf32>
    %97 = vector.multi_reduction <add>, %96, %cst_28 [1] : vector<8x16x64xf32> to vector<8x64xf32>
    %98 = vector.shape_cast %91 : vector<8x1x1xf32> to vector<8x1xf32>
    %99 = vector.extract_strided_slice %0 {offsets = [1, 0], sizes = [1, 64], strides = [1, 1]} : vector<16x64xf32> to vector<1x64xf32>
    %100 = vector.broadcast %98 : vector<8x1xf32> to vector<8x64xf32>
    %101 = vector.broadcast %99 : vector<1x64xf32> to vector<8x64xf32>
    %102 = arith.mulf %100, %101 : vector<8x64xf32>
    %103 = arith.addf %97, %102 : vector<8x64xf32>
    %104 = vector.shape_cast %94 : vector<8x1x1xf32> to vector<8x1xf32>
    %105 = tpu.reciprocal %104 {approx = true} : vector<8x1xf32> -> vector<8x1xf32>
    %106 = vector.broadcast %105 : vector<8x1xf32> to vector<8x64xf32>
    %107 = arith.mulf %103, %106 : vector<8x64xf32>
    %c0_29 = arith.constant 0 : index
    %c0_30 = arith.constant 0 : index
    %108 = vector.load %arg8[%c0_29, %c0_30] : memref<64x64xbf16, #tpu.memory_space<vmem>>, vector<64x64xbf16>
    %109 = arith.truncf %107 : vector<8x64xf32> to vector<8x64xbf16>
    %cst_31 = arith.constant dense<0.000000e+00> : vector<8x64xf32>
    %110 = tpu.matmul %109, %108, %cst_31 {dimension_numbers = #tpu.dot_dimension_numbers<[1], [0], [0], [1], [0, 0, 1, 1], [], []>} : vector<8x64xbf16>, vector<64x64xbf16>, vector<8x64xf32> -> vector<8x64xf32>
    %111 = vector.extract_strided_slice %0 {offsets = [10, 0], sizes = [1, 64], strides = [1, 1]} : vector<16x64xf32> to vector<1x64xf32>
    %112 = vector.broadcast %111 : vector<1x64xf32> to vector<8x64xf32>
    %113 = arith.addf %110, %112 : vector<8x64xf32>
    %114 = vector.extract_strided_slice %0 {offsets = [0, 0], sizes = [1, 64], strides = [1, 1]} : vector<16x64xf32> to vector<1x64xf32>
    %115 = vector.broadcast %114 : vector<1x64xf32> to vector<8x64xf32>
    %116 = arith.addf %115, %113 : vector<8x64xf32>
    %117 = vector.extract_strided_slice %0 {offsets = [7, 0], sizes = [1, 64], strides = [1, 1]} : vector<16x64xf32> to vector<1x64xf32>
    %118 = vector.extract_strided_slice %0 {offsets = [8, 0], sizes = [1, 64], strides = [1, 1]} : vector<16x64xf32> to vector<1x64xf32>
    %cst_32 = arith.constant dense<0.000000e+00> : vector<8xf32>
    %119 = vector.multi_reduction <add>, %116, %cst_32 [1] : vector<8x64xf32> to vector<8xf32>
    %120 = vector.shape_cast %119 : vector<8xf32> to vector<8x1xf32>
    %cst_33 = arith.constant 6.400000e+01 : f32
    %121 = vector.broadcast %cst_33 : f32 to vector<8x1xf32>
    %122 = arith.divf %120, %121 : vector<8x1xf32>
    %123 = vector.broadcast %122 : vector<8x1xf32> to vector<8x64xf32>
    %124 = arith.subf %116, %123 : vector<8x64xf32>
    %125 = arith.mulf %124, %124 : vector<8x64xf32>
    %cst_34 = arith.constant dense<0.000000e+00> : vector<8xf32>
    %126 = vector.multi_reduction <add>, %125, %cst_34 [1] : vector<8x64xf32> to vector<8xf32>
    %127 = vector.shape_cast %126 : vector<8xf32> to vector<8x1xf32>
    %cst_35 = arith.constant 6.400000e+01 : f32
    %128 = vector.broadcast %cst_35 : f32 to vector<8x1xf32>
    %129 = arith.divf %127, %128 : vector<8x1xf32>
    %130 = vector.broadcast %122 : vector<8x1xf32> to vector<8x64xf32>
    %131 = arith.subf %116, %130 : vector<8x64xf32>
    %cst_36 = arith.constant 9.99999974E-6 : f32
    %132 = vector.broadcast %cst_36 : f32 to vector<8x1xf32>
    %133 = arith.addf %129, %132 : vector<8x1xf32>
    %134 = math.rsqrt %133 : vector<8x1xf32>
    %135 = vector.broadcast %134 : vector<8x1xf32> to vector<8x64xf32>
    %136 = arith.mulf %131, %135 : vector<8x64xf32>
    %137 = vector.broadcast %117 : vector<1x64xf32> to vector<8x64xf32>
    %138 = arith.mulf %136, %137 : vector<8x64xf32>
    %139 = vector.broadcast %118 : vector<1x64xf32> to vector<8x64xf32>
    %140 = arith.addf %138, %139 : vector<8x64xf32>
    %c0_37 = arith.constant 0 : index
    %c0_38 = arith.constant 0 : index
    %141 = vector.load %arg9[%c0_37, %c0_38] : memref<64x256xbf16, #tpu.memory_space<vmem>>, vector<64x256xbf16>
    %142 = arith.truncf %140 : vector<8x64xf32> to vector<8x64xbf16>
    %cst_39 = arith.constant dense<0.000000e+00> : vector<8x256xf32>
    %143 = tpu.matmul %142, %141, %cst_39 {dimension_numbers = #tpu.dot_dimension_numbers<[1], [0], [0], [1], [0, 0, 1, 1], [], []>} : vector<8x64xbf16>, vector<64x256xbf16>, vector<8x256xf32> -> vector<8x256xf32>
    %c0_40 = arith.constant 0 : index
    %c0_41 = arith.constant 0 : index
    %144 = vector.load %arg10[%c0_40, %c0_41] : memref<1x256xf32, #tpu.memory_space<vmem>>, vector<1x256xf32>
    %145 = vector.broadcast %144 : vector<1x256xf32> to vector<8x256xf32>
    %146 = arith.addf %143, %145 : vector<8x256xf32>
    %cst_42 = arith.constant 1.702000e+00 : f32
    %147 = vector.broadcast %cst_42 : f32 to vector<8x256xf32>
    %148 = arith.mulf %147, %146 : vector<8x256xf32>
    %149 = arith.negf %148 : vector<8x256xf32>
    %150 = math.exp %149 : vector<8x256xf32>
    %cst_43 = arith.constant 1.000000e+00 : f32
    %151 = vector.broadcast %cst_43 : f32 to vector<8x256xf32>
    %152 = arith.addf %151, %150 : vector<8x256xf32>
    %153 = arith.divf %151, %152 : vector<8x256xf32>
    %154 = arith.mulf %146, %153 : vector<8x256xf32>
    %c0_44 = arith.constant 0 : index
    %c0_45 = arith.constant 0 : index
    %155 = vector.load %arg11[%c0_44, %c0_45] : memref<256x64xbf16, #tpu.memory_space<vmem>>, vector<256x64xbf16>
    %156 = arith.truncf %154 : vector<8x256xf32> to vector<8x256xbf16>
    %cst_46 = arith.constant dense<0.000000e+00> : vector<8x64xf32>
    %157 = tpu.matmul %156, %155, %cst_46 {dimension_numbers = #tpu.dot_dimension_numbers<[1], [0], [0], [1], [0, 0, 1, 1], [], []>} : vector<8x256xbf16>, vector<256x64xbf16>, vector<8x64xf32> -> vector<8x64xf32>
    %158 = vector.extract_strided_slice %0 {offsets = [11, 0], sizes = [1, 64], strides = [1, 1]} : vector<16x64xf32> to vector<1x64xf32>
    %159 = vector.broadcast %158 : vector<1x64xf32> to vector<8x64xf32>
    %160 = arith.addf %157, %159 : vector<8x64xf32>
    %161 = arith.addf %116, %160 : vector<8x64xf32>
    %c0_47 = arith.constant 0 : index
    %c0_48 = arith.constant 0 : index
    %162 = vector.load %arg12[%c0_47, %c0_48] : memref<64x128xbf16, #tpu.memory_space<vmem>>, vector<64x128xbf16>
    %163 = arith.truncf %161 : vector<8x64xf32> to vector<8x64xbf16>
    %cst_49 = arith.constant dense<0.000000e+00> : vector<8x128xf32>
    %164 = tpu.matmul %163, %162, %cst_49 {dimension_numbers = #tpu.dot_dimension_numbers<[1], [0], [0], [1], [0, 0, 1, 1], [], []>} : vector<8x64xbf16>, vector<64x128xbf16>, vector<8x128xf32> -> vector<8x128xf32>
    %c0_50 = arith.constant 0 : index
    %c0_51 = arith.constant 0 : index
    %165 = vector.load %arg13[%c0_50, %c0_51] : memref<1x128xf32, #tpu.memory_space<vmem>>, vector<1x128xf32>
    %166 = vector.broadcast %165 : vector<1x128xf32> to vector<8x128xf32>
    %167 = arith.addf %164, %166 : vector<8x128xf32>
    %c0_52 = arith.constant 0 : index
    %c0_53 = arith.constant 0 : index
    %168 = vector.load %arg14[%c0_52, %c0_53] : memref<8x128xf32, #tpu.memory_space<vmem>>, vector<8x128xf32>
    tpu.vector_store %arg14[%c0_52, %c0_53], %167 {strides = array<i32>} : memref<8x128xf32, #tpu.memory_space<vmem>>, vector<8x128xf32>,
    return
  }
  func.func @transform_0(%arg0: i32) -> (i32, i32, i32) {
    %c0_i32 = arith.constant 0 : i32
    %c0_i32_0 = arith.constant 0 : i32
    %c0_i32_1 = arith.constant 0 : i32
    return %arg0, %c0_i32, %c0_i32_0 : i32, i32, i32
  }
  func.func @transform_1(%arg0: i32) -> (i32, i32) {
    %c0_i32 = arith.constant 0 : i32
    %c0_i32_0 = arith.constant 0 : i32
    %c0_i32_1 = arith.constant 0 : i32
    return %c0_i32, %c0_i32_0 : i32, i32
  }
  func.func @transform_2(%arg0: i32) -> (i32, i32) {
    %c0_i32 = arith.constant 0 : i32
    %c0_i32_0 = arith.constant 0 : i32
    %c0_i32_1 = arith.constant 0 : i32
    return %c0_i32, %c0_i32_0 : i32, i32
  }
  func.func @transform_3(%arg0: i32) -> (i32, i32) {
    %c0_i32 = arith.constant 0 : i32
    %c0_i32_0 = arith.constant 0 : i32
    %c0_i32_1 = arith.constant 0 : i32
    return %c0_i32, %c0_i32_0 : i32, i32
  }
  func.func @transform_4(%arg0: i32) -> (i32, i32) {
    %c0_i32 = arith.constant 0 : i32
    %c0_i32_0 = arith.constant 0 : i32
    %c0_i32_1 = arith.constant 0 : i32
    return %c0_i32, %c0_i32_0 : i32, i32
  }
  func.func @transform_5(%arg0: i32) -> (i32, i32) {
    %c0_i32 = arith.constant 0 : i32
    %c0_i32_0 = arith.constant 0 : i32
    %c0_i32_1 = arith.constant 0 : i32
    return %c0_i32, %c0_i32_0 : i32, i32
  }
  func.func @transform_6(%arg0: i32) -> (i32, i32) {
    %c0_i32 = arith.constant 0 : i32
    %c0_i32_0 = arith.constant 0 : i32
    %c0_i32_1 = arith.constant 0 : i32
    return %c0_i32, %c0_i32_0 : i32, i32
  }
  func.func @transform_7(%arg0: i32) -> (i32, i32) {
    %c0_i32 = arith.constant 0 : i32
    %c0_i32_0 = arith.constant 0 : i32
    %c0_i32_1 = arith.constant 0 : i32
    return %c0_i32, %c0_i32_0 : i32, i32
  }
  func.func @transform_8(%arg0: i32) -> (i32, i32) {
    %c0_i32 = arith.constant 0 : i32
    %c0_i32_0 = arith.constant 0 : i32
    %c0_i32_1 = arith.constant 0 : i32
    return %c0_i32, %c0_i32_0 : i32, i32
  }
  func.func @transform_9(%arg0: i32) -> (i32, i32) {
    %c0_i32 = arith.constant 0 : i32
    %c0_i32_0 = arith.constant 0 : i32
    %c0_i32_1 = arith.constant 0 : i32
    return %c0_i32, %c0_i32_0 : i32, i32
  }
  func.func @transform_10(%arg0: i32) -> (i32, i32) {
    %c0_i32 = arith.constant 0 : i32
    %c0_i32_0 = arith.constant 0 : i32
    %c0_i32_1 = arith.constant 0 : i32
    return %c0_i32, %c0_i32_0 : i32, i32
  }
  func.func @transform_11(%arg0: i32) -> (i32, i32) {
    %c0_i32 = arith.constant 0 : i32
    %c0_i32_0 = arith.constant 0 : i32
    %c0_i32_1 = arith.constant 0 : i32
    return %c0_i32, %c0_i32_0 : i32, i32
  }
  func.func @transform_12(%arg0: i32) -> (i32, i32) {
    %c0_i32 = arith.constant 0 : i32
    %c0_i32_0 = arith.constant 0 : i32
    %c0_i32_1 = arith.constant 0 : i32
    return %c0_i32, %c0_i32_0 : i32, i32
  }
  func.func @transform_13(%arg0: i32) -> (i32, i32) {
    %c0_i32 = arith.constant 0 : i32
    %c0_i32_0 = arith.constant 0 : i32
    return %arg0, %c0_i32 : i32, i32
  }
}

</mosaic_0001>

<bundles_post_ra>
// kernel: simplified_cloth_encoder_forward.1
= control target key start
LH: loop header
LB: loop body
LE: loop exit
PB: predicated region body
PF: predicated region fallthrough
CT: control target
= control target key end

     0   :  { %18 = vsyncpa [#allocation3], 0  ;;  %s4325_s0 = inlined_call_operand.hbm [shape: f32[8,16,192], index: 0, kind: input, shape index: {}]   ;;  %s4326_s1 = inlined_call_operand.hbm [shape: bf16[192,64], index: 1, kind: input, shape index: {}]   ;;  %s4327_s2 = inlined_call_operand.hbm [shape: f32[1,64], index: 2, kind: input, shape index: {}]   ;;  %s4328_s3 = inlined_call_operand.hbm [shape: f32[16,64], index: 3, kind: input, shape index: {}]   ;;  %s4329_s4 = inlined_call_operand.hbm [shape: f32[16,64], index: 4, kind: input, shape index: {}]   ;;  %s4330_s5 = inlined_call_operand.hbm [shape: bf16[64,128], index: 5, kind: input, shape index: {}]   ;;  %s4331_s6 = inlined_call_operand.hbm [shape: bf16[64,64], index: 6, kind: input, shape index: {}]   ;;  %s4332_s7 = inlined_call_operand.hbm [shape: bf16[64,64], index: 7, kind: input, shape index: {}]   ;;  %s4333_s8 = inlined_call_operand.hbm [shape: bf16[64,256], index: 8, kind: input, shape index: {}]   ;;  %s4334_s9 = inlined_call_operand.hbm [shape: f32[1,256], index: 9, kind: input, shape index: {}]   ;;  %s4335_s10 = inlined_call_operand.hbm [shape: bf16[256,64], index: 10, kind: input, shape index: {}]   ;;  %s4336_s11 = inlined_call_operand.hbm [shape: bf16[64,128], index: 11, kind: input, shape index: {}]   ;;  %s4337_s12 = inlined_call_operand.hbm [shape: f32[1,128], index: 12, kind: input, shape index: {}]   ;;  %s4338_s13 = inlined_call_operand.hbm [shape: f32[8,128], index: 13, kind: output, shape index: {}]  }
   0x1   :  { %19 = vsyncpa [#allocation6], 0 }
   0x2   :  { %20 = vsyncpa [#allocation9], 0 }
   0x3   :  { %21 = vsyncpa [#allocation12], 0 }
   0x4   :  { %22 = vsyncpa [#allocation15], 0 }
   0x5   :  { %23 = vsyncpa [#allocation18], 0 }
   0x6   :  { %24 = vsyncpa [#allocation21], 0 }
   0x7   :  { %25 = vsyncpa [#allocation4], 0  ;;  %s3159_s25 = smov [#allocation5]   ;;  %s2835_s29 = scalar_lea.hbm %s4326_s1, 1536 }
   0x8   :  { %s43_s26 = sshll.u32 %s3159_s25, 4  ;;  %p2836_p0 = scmp.ne.s32.totalorder %s4326_s1, %s2835_s29  ;;  %s44_s26 = int_to_ptr.vmem [resolvable:$true] %s43_s26 }
   0x9   :  { %p2839_p1 = scmp.lt.u32.totalorder %s2835_s29, %s4326_s1 }
   0xb   :  { %p2841_p2 = pnand %p2839_p1, %p2836_p0 }
   0xd   :  { %2844 = shalt.err (!%p2841_p2)
}
   0xe   :  { %s2845_s17 = scalar_lea.vmem %s44_s26, 1536  ;;  %p2850_p4 = scmp.lt.s32.totalorder %s44_s26, %s44_s26 }
   0xf   :  { %p2846_p3 = scmp.ne.s32.totalorder %s44_s26, %s2845_s17  ;;  %p2851_p5 = scmp.lt.s32.totalorder %s2845_s17, %s2845_s17 }
  0x11   :  { %p2852_p6 = por %p2851_p5, %p2850_p4 }
  0x13   :  { %p2853_p7 = pnand %p2852_p6, %p2846_p3 }
  0x15   :  { %2856 = shalt.err (!%p2853_p7)
}
  0x16   :  { %s3160_s18 = smov 64   ;;  %s3161_s19 = smov 4  }
  0x17   :  { %49 = dma.hbm_to_vmem [thread:$0]  %s4326_s1, 1536, %s44_s26, [#allocation6], %s3160_s18, %s3160_s18, %s3161_s19  }
  0x18   :  { %s3162_s22 = smov [#allocation8]   ;;  %s2857_s27 = scalar_lea.hbm %s4328_s3, 256 }
  0x19   :  { %s65_s23 = sshll.u32 %s3162_s22, 4  ;;  %p2858_p8 = scmp.ne.s32.totalorder %s4328_s3, %s2857_s27  ;;  %s66_s23 = int_to_ptr.vmem [resolvable:$true] %s65_s23 }
  0x1a   :  { %p2861_p9 = scmp.lt.u32.totalorder %s2857_s27, %s4328_s3 }
  0x1c   :  { %p2863_p10 = pnand %p2861_p9, %p2858_p8 }
  0x1e   :  { %2866 = shalt.err (!%p2863_p10)
}
  0x1f   :  { %s2867_s15 = scalar_lea.vmem %s66_s23, 256  ;;  %p2872_p12 = scmp.lt.s32.totalorder %s66_s23, %s66_s23 }
  0x20   :  { %p2868_p11 = scmp.ne.s32.totalorder %s66_s23, %s2867_s15  ;;  %p2873_p13 = scmp.lt.s32.totalorder %s2867_s15, %s2867_s15 }
  0x22   :  { %p2874_p0 = por %p2873_p13, %p2872_p12 }
  0x24   :  { %p2875_p1 = pnand %p2874_p0, %p2868_p11 }
  0x26   :  { %2878 = shalt.err (!%p2875_p1)
}
  0x27   :  { %s3163_s1 = smov 128   ;;  %s3164_s26 = smov 8  }
  0x28   :  { %71 = dma.hbm_to_vmem [thread:$0]  %s4328_s3, 256, %s66_s23, [#allocation9], %s3163_s1, %s3163_s1, %s3164_s26  }
  0x29   :  { %s3165_s20 = smov [#allocation11]   ;;  %s3166_s22 = smov [#allocation14]  }
  0x2a   :  { %s89_s21 = sshll.u32 %s3165_s20, 4  ;;  %s113_s24 = sshll.u32 %s3166_s22, 4  ;;  %s90_s21 = int_to_ptr.vmem [resolvable:$true] %s89_s21  ;;  %s3282_s24 = int_to_ptr.vmem [resolvable:$true] %s113_s24 }
  0x2b   :  { %s2879_s28 = scalar_lea.hbm %s4330_s5, 512 }
  0x2c   :  { %p2880_p2 = scmp.ne.s32.totalorder %s4330_s5, %s2879_s28  ;;  %p2883_p3 = scmp.lt.u32.totalorder %s2879_s28, %s4330_s5 }
  0x2e   :  { %p2885_p4 = pnand %p2883_p3, %p2880_p2 }
  0x30   :  { %2888 = shalt.err (!%p2885_p4)
}
  0x31   :  { %s2889_s3 = scalar_lea.vmem %s90_s21, 512  ;;  %p2894_p6 = scmp.lt.s32.totalorder %s90_s21, %s90_s21 }
  0x32   :  { %p2890_p5 = scmp.ne.s32.totalorder %s90_s21, %s2889_s3  ;;  %p2895_p7 = scmp.lt.s32.totalorder %s2889_s3, %s2889_s3 }
  0x34   :  { %p2896_p8 = por %p2895_p7, %p2894_p6 }
  0x36   :  { %p2897_p9 = pnand %p2896_p8, %p2890_p5 }
  0x38   :  { %2900 = shalt.err (!%p2897_p9)
}
  0x39   :  { %95 = dma.hbm_to_vmem [thread:$0]  %s4330_s5, 512, %s90_s21, [#allocation12], %s3160_s18, %s3160_s18, %s3161_s19  }
  0x3a   :  { %s2901_s22 = scalar_lea.hbm %s4332_s7, 512 }
  0x3b   :  { %p2902_p10 = scmp.ne.s32.totalorder %s4332_s7, %s2901_s22  ;;  %p2905_p11 = scmp.lt.u32.totalorder %s2901_s22, %s4332_s7 }
  0x3d   :  { %p2907_p12 = pnand %p2905_p11, %p2902_p10 }
  0x3f   :  { %2910 = shalt.err (!%p2907_p12)
}
  0x40   :  { %s2911_s30 = scalar_lea.vmem %s3282_s24, 512  ;;  %p2916_p0 = scmp.lt.s32.totalorder %s3282_s24, %s3282_s24 }
  0x41   :  { %p2912_p13 = scmp.ne.s32.totalorder %s3282_s24, %s2911_s30  ;;  %p2917_p1 = scmp.lt.s32.totalorder %s2911_s30, %s2911_s30 }
  0x43   :  { %p2918_p2 = por %p2917_p1, %p2916_p0 }
  0x45   :  { %p2919_p3 = pnand %p2918_p2, %p2912_p13 }
  0x47   :  { %2922 = shalt.err (!%p2919_p3)
}
  0x48   :  { %119 = dma.hbm_to_vmem [thread:$0]  %s4332_s7, 512, %s3282_s24, [#allocation15], %s3160_s18, %s3160_s18, %s3161_s19  }
  0x49   :  { %s3167_s14 = smov [#allocation17]   ;;  %s3168_s3 = smov [#allocation20]  }
  0x4a   :  { %s138_s15 = sshll.u32 %s3167_s14, 4  ;;  %s159_s23 = sshll.u32 %s3168_s3, 4  ;;  %s139_s15 = int_to_ptr.vmem [resolvable:$true] %s138_s15  ;;  %s3319_s23 = int_to_ptr.vmem [resolvable:$true] %s159_s23 }
  0x4b   :  { %s2923_s20 = scalar_lea.hbm %s4334_s9, 32 }
  0x4c   :  { %p2924_p4 = scmp.ne.s32.totalorder %s4334_s9, %s2923_s20  ;;  %p2927_p5 = scmp.lt.u32.totalorder %s2923_s20, %s4334_s9 }
  0x4e   :  { %p2929_p6 = pnand %p2927_p5, %p2924_p4 }
  0x50   :  { %2932 = shalt.err (!%p2929_p6)
}
  0x51   :  { %s2933_s7 = scalar_lea.vmem %s139_s15, 32  ;;  %p2938_p8 = scmp.lt.s32.totalorder %s139_s15, %s139_s15 }
  0x52   :  { %p2934_p7 = scmp.ne.s32.totalorder %s139_s15, %s2933_s7  ;;  %p2939_p9 = scmp.lt.s32.totalorder %s2933_s7, %s2933_s7 }
  0x54   :  { %p2940_p10 = por %p2939_p9, %p2938_p8 }
  0x56   :  { %p2941_p11 = pnand %p2940_p10, %p2934_p7 }
  0x58   :  { %2944 = shalt.err (!%p2941_p11)
}
  0x59   :  { %141 = dma.hbm_to_vmem [thread:$0]  %s4334_s9, 32, %s139_s15, [#allocation18]  }
  0x5a   :  { %s2945_s21 = scalar_lea.hbm %s4336_s11, 512 }
  0x5b   :  { %p2946_p12 = scmp.ne.s32.totalorder %s4336_s11, %s2945_s21  ;;  %p2949_p13 = scmp.lt.u32.totalorder %s2945_s21, %s4336_s11 }
  0x5d   :  { %p2951_p0 = pnand %p2949_p13, %p2946_p12 }
  0x5f   :  { %2954 = shalt.err (!%p2951_p0)
}
  0x60   :  { %s2955_s20 = scalar_lea.vmem %s3319_s23, 512  ;;  %p2960_p2 = scmp.lt.s32.totalorder %s3319_s23, %s3319_s23 }
  0x61   :  { %p2956_p1 = scmp.ne.s32.totalorder %s3319_s23, %s2955_s20  ;;  %p2961_p3 = scmp.lt.s32.totalorder %s2955_s20, %s2955_s20 }
  0x63   :  { %p2962_p4 = por %p2961_p3, %p2960_p2 }
  0x65   :  { %p2963_p5 = pnand %p2962_p4, %p2956_p1 }
  0x67   :  { %2966 = shalt.err (!%p2963_p5)
}
  0x68   :  { %165 = dma.hbm_to_vmem [thread:$0]  %s4336_s11, 512, %s3319_s23, [#allocation21], %s3160_s18, %s3160_s18, %s3161_s19  }
  0x69   :  { %s3169_s22 = smov [#allocation2]   ;;  %s2967_s7 = scalar_lea.hbm %s4325_s0, 4096 }
  0x6a   :  { %s31_s25 = sshll.u32 %s3169_s22, 4  ;;  %p2968_p6 = scmp.ne.s32.totalorder %s4325_s0, %s2967_s7  ;;  %s32_s25 = int_to_ptr.vmem [resolvable:$true] %s31_s25 }
  0x6b   :  { %p2971_p7 = scmp.lt.u32.totalorder %s2967_s7, %s4325_s0 }
  0x6d   :  { %p2973_p8 = pnand %p2971_p7, %p2968_p6 }
  0x6f   :  { %2976 = shalt.err (!%p2973_p8)
}
  0x70   :  { %s2977_s21 = scalar_lea.vmem %s32_s25, 4096  ;;  %p2982_p10 = scmp.lt.s32.totalorder %s32_s25, %s32_s25 }
  0x71   :  { %p2978_p9 = scmp.ne.s32.totalorder %s32_s25, %s2977_s21  ;;  %p2983_p11 = scmp.lt.s32.totalorder %s2977_s21, %s2977_s21 }
  0x73   :  { %p2984_p12 = por %p2983_p11, %p2982_p10 }
  0x75   :  { %p2985_p13 = pnand %p2984_p12, %p2978_p9 }
  0x77   :  { %2988 = shalt.err (!%p2985_p13)
}
  0x78   :  { %s3170_s11 = smov 256   ;;  %s3171_s23 = smov 16  }
  0x79   :  { %37 = dma.hbm_to_vmem [thread:$0]  %s4325_s0, 4096, %s32_s25, [#allocation3], %s3170_s11, %s3170_s11, %s3171_s23  }
  0x7a   :  { %s3172_s16 = smov [#allocation7]   ;;  %s3173_s20 = smov [#allocation10]  }
  0x7b   :  { %s56_s17 = sshll.u32 %s3172_s16, 4  ;;  %s77_s9 = sshll.u32 %s3173_s20, 4  ;;  %s57_s17 = int_to_ptr.vmem [resolvable:$true] %s56_s17  ;;  %s78_s9 = int_to_ptr.vmem [resolvable:$true] %s77_s9 }
  0x7c   :  { %s2989_s27 = scalar_lea.hbm %s4327_s2, 16 }
  0x7d   :  { %p2990_p0 = scmp.ne.s32.totalorder %s4327_s2, %s2989_s27  ;;  %p2993_p1 = scmp.lt.u32.totalorder %s2989_s27, %s4327_s2 }
  0x7f   :  { %p2995_p2 = pnand %p2993_p1, %p2990_p0 }
  0x81   :  { %2998 = shalt.err (!%p2995_p2)
}
  0x82   :  { %s2999_s0 = scalar_lea.vmem %s57_s17, 16  ;;  %s3003_s25 = scalar_lea.vmem %s57_s17, 32 }
  0x83   :  { %p3000_p3 = scmp.ne.s32.totalorder %s57_s17, %s2999_s0  ;;  %p3004_p4 = scmp.lt.s32.totalorder %s57_s17, %s57_s17 }
  0x84   :  { %p3005_p5 = scmp.lt.s32.totalorder %s3003_s25, %s2999_s0 }
  0x86   :  { %p3006_p6 = por %p3005_p5, %p3004_p4 }
  0x88   :  { %p3007_p7 = pnand %p3006_p6, %p3000_p3 }
  0x8a   :  { %3010 = shalt.err (!%p3007_p7)
}
  0x8b   :  { %59 = dma.hbm_to_vmem [thread:$0]  %s4327_s2, 16, %s57_s17, [#allocation6]  }
  0x8c   :  { %s3011_s23 = scalar_lea.hbm %s4329_s4, 256 }
  0x8d   :  { %p3012_p8 = scmp.ne.s32.totalorder %s4329_s4, %s3011_s23  ;;  %p3015_p9 = scmp.lt.u32.totalorder %s3011_s23, %s4329_s4 }
  0x8f   :  { %p3017_p10 = pnand %p3015_p9, %p3012_p8 }
  0x91   :  { %3020 = shalt.err (!%p3017_p10)
}
  0x92   :  { %s3021_s15 = scalar_lea.vmem %s78_s9, 256  ;;  %p3026_p12 = scmp.lt.s32.totalorder %s78_s9, %s78_s9 }
  0x93   :  { %p3022_p11 = scmp.ne.s32.totalorder %s78_s9, %s3021_s15  ;;  %p3027_p13 = scmp.lt.s32.totalorder %s3021_s15, %s3021_s15 }
  0x95   :  { %p3028_p0 = por %p3027_p13, %p3026_p12 }
  0x97   :  { %p3029_p1 = pnand %p3028_p0, %p3022_p11 }
  0x99   :  { %3032 = shalt.err (!%p3029_p1)
}
  0x9a   :  { %83 = dma.hbm_to_vmem [thread:$0]  %s4329_s4, 256, %s78_s9, [#allocation9], %s3163_s1, %s3163_s1, %s3164_s26  }
  0x9b   :  { %s3174_s22 = smov [#allocation13]   ;;  %s3175_s28 = smov [#allocation16]  }
  0x9c   :  { %s101_s27 = sshll.u32 %s3174_s22, 4  ;;  %s125_s7 = sshll.u32 %s3175_s28, 4  ;;  %s102_s27 = int_to_ptr.vmem [resolvable:$true] %s101_s27  ;;  %s126_s7 = int_to_ptr.vmem [resolvable:$true] %s125_s7 }
  0x9d   :  { %s3033_s0 = scalar_lea.hbm %s4331_s6, 512 }
  0x9e   :  { %p3034_p2 = scmp.ne.s32.totalorder %s4331_s6, %s3033_s0  ;;  %p3037_p3 = scmp.lt.u32.totalorder %s3033_s0, %s4331_s6 }
  0xa0   :  { %p3039_p4 = pnand %p3037_p3, %p3034_p2 }
  0xa2   :  { %3042 = shalt.err (!%p3039_p4)
}
  0xa3   :  { %s3043_s4 = scalar_lea.vmem %s102_s27, 512  ;;  %p3048_p6 = scmp.lt.s32.totalorder %s102_s27, %s102_s27 }
  0xa4   :  { %p3044_p5 = scmp.ne.s32.totalorder %s102_s27, %s3043_s4  ;;  %p3049_p7 = scmp.lt.s32.totalorder %s3043_s4, %s3043_s4 }
  0xa6   :  { %p3050_p8 = por %p3049_p7, %p3048_p6 }
  0xa8   :  { %p3051_p9 = pnand %p3050_p8, %p3044_p5 }
  0xaa   :  { %3054 = shalt.err (!%p3051_p9)
}
  0xab   :  { %107 = dma.hbm_to_vmem [thread:$0]  %s4331_s6, 512, %s102_s27, [#allocation12], %s3160_s18, %s3160_s18, %s3161_s19  }
  0xac   :  { %s3055_s3 = scalar_lea.hbm %s4333_s8, 1024 }
  0xad   :  { %p3056_p10 = scmp.ne.s32.totalorder %s4333_s8, %s3055_s3  ;;  %p3059_p11 = scmp.lt.u32.totalorder %s3055_s3, %s4333_s8 }
  0xaf   :  { %p3061_p12 = pnand %p3059_p11, %p3056_p10 }
  0xb1   :  { %3064 = shalt.err (!%p3061_p12)
}
  0xb2   :  { %s3065_s17 = scalar_lea.vmem %s126_s7, 1024  ;;  %p3070_p0 = scmp.lt.s32.totalorder %s126_s7, %s126_s7 }
  0xb3   :  { %p3066_p13 = scmp.ne.s32.totalorder %s126_s7, %s3065_s17  ;;  %p3071_p1 = scmp.lt.s32.totalorder %s3065_s17, %s3065_s17 }
  0xb5   :  { %p3072_p2 = por %p3071_p1, %p3070_p0 }
  0xb7   :  { %p3073_p3 = pnand %p3072_p2, %p3066_p13 }
  0xb9   :  { %3076 = shalt.err (!%p3073_p3)
}
  0xba   :  { %131 = dma.hbm_to_vmem [thread:$0]  %s4333_s8, 1024, %s126_s7, [#allocation15], %s3163_s1, %s3163_s1, %s3164_s26  }
  0xbb   :  { %s3176_s27 = smov [#allocation19]   ;;  %s3177_s24 = smov [#allocation22]  }
  0xbc   :  { %s147_s28 = sshll.u32 %s3176_s27, 4  ;;  %s172_s29 = sshll.u32 %s3177_s24, 4  ;;  %s148_s28 = int_to_ptr.vmem [resolvable:$true] %s147_s28  ;;  %s173_s29 = int_to_ptr.vmem [resolvable:$true] %s172_s29 }
  0xbd   :  { %s3077_s30 = scalar_lea.hbm %s4335_s10, 2048 }
  0xbe   :  { %p3078_p4 = scmp.ne.s32.totalorder %s4335_s10, %s3077_s30  ;;  %p3081_p5 = scmp.lt.u32.totalorder %s3077_s30, %s4335_s10 }
  0xc0   :  { %p3083_p6 = pnand %p3081_p5, %p3078_p4 }
  0xc2   :  { %3086 = shalt.err (!%p3083_p6)
}
  0xc3   :  { %s3087_s8 = scalar_lea.vmem %s148_s28, 2048  ;;  %p3092_p8 = scmp.lt.s32.totalorder %s148_s28, %s148_s28 }
  0xc4   :  { %p3088_p7 = scmp.ne.s32.totalorder %s148_s28, %s3087_s8  ;;  %p3093_p9 = scmp.lt.s32.totalorder %s3087_s8, %s3087_s8 }
  0xc6   :  { %p3094_p10 = por %p3093_p9, %p3092_p8 }
  0xc8   :  { %p3095_p11 = pnand %p3094_p10, %p3088_p7 }
  0xca   :  { %3098 = shalt.err (!%p3095_p11)
}
  0xcb   :  { %153 = dma.hbm_to_vmem [thread:$0]  %s4335_s10, 2048, %s148_s28, [#allocation18], %s3160_s18, %s3160_s18, %s3161_s19  }
  0xcc   :  { %s3099_s23 = scalar_lea.hbm %s4337_s12, 16 }
  0xcd   :  { %p3100_p12 = scmp.ne.s32.totalorder %s4337_s12, %s3099_s23  ;;  %p3103_p13 = scmp.lt.u32.totalorder %s3099_s23, %s4337_s12 }
  0xcf   :  { %p3105_p0 = pnand %p3103_p13, %p3100_p12 }
  0xd1   :  { %3108 = shalt.err (!%p3105_p0)
}
  0xd2   :  { %s3109_s15 = scalar_lea.vmem %s173_s29, 16  ;;  %s3113_s2 = scalar_lea.vmem %s173_s29, 32 }
  0xd3   :  { %p3110_p1 = scmp.ne.s32.totalorder %s173_s29, %s3109_s15  ;;  %p3114_p2 = scmp.lt.s32.totalorder %s173_s29, %s173_s29 }
  0xd4   :  { %p3115_p3 = scmp.lt.s32.totalorder %s3113_s2, %s3109_s15 }
  0xd6   :  { %p3116_p4 = por %p3115_p3, %p3114_p2 }
  0xd8   :  { %p3117_p5 = pnand %p3116_p4, %p3110_p1 }
  0xda   :  { %3120 = shalt.err (!%p3117_p5)
}
  0xdb   :  { %175 = dma.hbm_to_vmem [thread:$0]  %s4337_s12, 16, %s173_s29, [#allocation21]  }
  0xdc   :  { %3143 = dma.done.wait [#allocation3], 4096  }
  0xdd   :  { %3144 = vsyncadd [#allocation3], 4294963200 }
  0xde   :  { %3145 = dma.done.wait [#allocation6], 1552  }
  0xdf   :  { %3146 = vsyncadd [#allocation6], 4294965744 }
  0xe0   :  { %3147 = dma.done.wait [#allocation9], 512  }
  0xe1   :  { %3148 = vsyncadd [#allocation9], 4294966784 }
  0xe2   :  { %3149 = dma.done.wait [#allocation12], 1024  }
  0xe3   :  { %3150 = vsyncadd [#allocation12], 4294966272 }
  0xe4   :  { %3151 = dma.done.wait [#allocation15], 1536  }
  0xe5   :  { %3152 = vsyncadd [#allocation15], 4294965760 }
  0xe6   :  { %3153 = dma.done.wait [#allocation18], 2080  }
  0xe7   :  { %3154 = vsyncadd [#allocation18], 4294965216 }
  0xe8   :  { %3155 = dma.done.wait [#allocation21], 528  }
  0xe9   :  { %3156 = vsyncadd [#allocation21], 4294966768  ;;  %v3178_v0 = vmov 0   ;;  %v2639_v1 = vld [vmem:[#allocation5] sm:$0xff]   ;;  %v2640_v2 = vld [vmem:[#allocation5 + $0x8] sm:$0xff]   ;;  %vm369_vm0 = vcmask 523264  }
  0xea   :  { %394 = vmatprep.subr.bf16.mxu0 %v3178_v0  ;;  %2637 = vset.pattern.permute.xlu0 %v3178_v0  ;;  %v2641_v3 = vld [vmem:[#allocation5 + $0x10] sm:$0xff]   ;;  %v2642_v4 = vld [vmem:[#allocation5 + $0x18] sm:$0xff]   ;;  %v219_v5 = vld [vmem:[#allocation2 + $0x8] sm:$0xff]  ;;  %vm1300_vm1 = vcmask 7168   ;;  %vm3180_vm2 = vmmov 0   ;;  %vm1887_vm3 = vcmask 1041409  }
  0xeb   :  { %2638 = vset.pattern.permute.xlu1 %v3178_v0  ;;  %395 = vmatpush1.bf16.msra.mxu0 %v2639_v1  ;;  %v221_v6 = vld [vmem:[#allocation2 + $0x18] sm:$0xff]  ;;  %v2643_v8 = vld [vmem:[#allocation5 + $0x20] sm:$0xff]   ;;  %v2644_v9 = vld [vmem:[#allocation5 + $0x28] sm:$0xff]   ;;  %vm1889_vm4 = vcmask 1042434   ;;  %vm1892_vm5 = vcmask 1043459   ;;  %vm1895_vm6 = vcmask 1044484  }
  0xec   :  { %396 = vmatprep.subr.bf16.mxu0 %v3178_v0  ;;  %v275_v7 = vpack.c.bf16 %v221_v6, %v219_v5  ;;  %v2645_v10 = vld [vmem:[#allocation5 + $0x30] sm:$0xff]   ;;  %v2646_v11 = vld [vmem:[#allocation5 + $0x38] sm:$0xff]   ;;  %v2647_v12 = vld [vmem:[#allocation5 + $0x40] sm:$0xff]   ;;  %vm1898_vm7 = vcmask 1045509   ;;  %vm1901_vm8 = vcmask 1046534   ;;  %vm1904_vm9 = vcmask 1047559  }
  0xed   :  { %v2648_v13 = vld [vmem:[#allocation5 + $0x48] sm:$0xff]   ;;  %v2649_v14 = vld [vmem:[#allocation5 + $0x50] sm:$0xff]   ;;  %v2650_v15 = vld [vmem:[#allocation5 + $0x58] sm:$0xff]   ;;  %s3181_s12 = smov [#allocation23]  }
  0xee   :  { %2416 = vmatprep.mubr.msk.bf16.mxu0 %vm369_vm0, %v275_v7  ;;  %v218_v16 = vld [vmem:[#allocation2] sm:$0xff]  ;;  %v220_v17 = vld [vmem:[#allocation2 + $0x10] sm:$0xff]  ;;  %v223_v18 = vld [vmem:[#allocation2 + $0x28] sm:$0xff]  ;;  %s2388_s19 = sshll.u32 %s3181_s12, 4  ;;  %s2389_s19 = int_to_ptr.vmem [resolvable:$true] %s2388_s19 }
  0xef   :  { %397 = vmatpush1.bf16.msra.mxu0 %v2640_v2  ;;  %v225_v19 = vld [vmem:[#allocation2 + $0x38] sm:$0xff]  ;;  %v274_v20 = vpack.c.bf16 %v220_v17, %v218_v16  ;;  %v222_v22 = vld [vmem:[#allocation2 + $0x20] sm:$0xff]  ;;  %v224_v23 = vld [vmem:[#allocation2 + $0x30] sm:$0xff]  ;;  %s3121_s17 = scalar_lea.vmem %s2389_s19, 128  ;;  %p3126_p7 = scmp.lt.s32.totalorder %s2389_s19, %s2389_s19 }
  0xf0   :  { %398 = vmatprep.subr.bf16.mxu0 %v3178_v0  ;;  %v277_v21 = vpack.c.bf16 %v225_v19, %v223_v18  ;;  %v227_v24 = vld [vmem:[#allocation2 + $0x48] sm:$0xff]  ;;  %v229_v25 = vld [vmem:[#allocation2 + $0x58] sm:$0xff]  ;;  %v276_v26 = vpack.c.bf16 %v224_v23, %v222_v22  ;;  %v226_v28 = vld [vmem:[#allocation2 + $0x40] sm:$0xff]  ;;  %p3122_p6 = scmp.ne.s32.totalorder %s2389_s19, %s3121_s17  ;;  %p3127_p8 = scmp.lt.s32.totalorder %s3121_s17, %s3121_s17 }
  0xf1   :  { %v279_v27 = vpack.c.bf16 %v229_v25, %v227_v24  ;;  %v228_v29 = vld [vmem:[#allocation2 + $0x50] sm:$0xff]  ;;  %v231_v30 = vld [vmem:[#allocation2 + $0x68] sm:$0xff]  ;;  %v233_v31 = vld [vmem:[#allocation2 + $0x78] sm:$0xff] }
  0xf2   :  { %v278_v32 = vpack.c.bf16 %v228_v29, %v226_v28  ;;  %v281_v33 = vpack.c.bf16 %v233_v31, %v231_v30  ;;  %v230_v34 = vld [vmem:[#allocation2 + $0x60] sm:$0xff]  ;;  %v232_v35 = vld [vmem:[#allocation2 + $0x70] sm:$0xff]  ;;  %v235_v36 = vld [vmem:[#allocation2 + $0x88] sm:$0xff]  ;;  %p3128_p9 = por %p3127_p8, %p3126_p7 }
  0xf3   :  { %399 = vmatpush1.bf16.msra.mxu0 %v2641_v3  ;;  %v237_v37 = vld [vmem:[#allocation2 + $0x98] sm:$0xff]  ;;  %v280_v38 = vpack.c.bf16 %v232_v35, %v230_v34  ;;  %v234_v40 = vld [vmem:[#allocation2 + $0x80] sm:$0xff]  ;;  %v236_v41 = vld [vmem:[#allocation2 + $0x90] sm:$0xff] }
  0xf4   :  { %400 = vmatprep.subr.bf16.mxu0 %v3178_v0  ;;  %v283_v39 = vpack.c.bf16 %v237_v37, %v235_v36  ;;  %v239_v42 = vld [vmem:[#allocation2 + $0xa8] sm:$0xff]  ;;  %v241_v43 = vld [vmem:[#allocation2 + $0xb8] sm:$0xff]  ;;  %v282_v44 = vpack.c.bf16 %v236_v41, %v234_v40  ;;  %v238_v46 = vld [vmem:[#allocation2 + $0xa0] sm:$0xff]  ;;  %p3129_p10 = pnand %p3128_p9, %p3122_p6 }
  0xf5   :  { %v285_v45 = vpack.c.bf16 %v241_v43, %v239_v42  ;;  %v240_v47 = vld [vmem:[#allocation2 + $0xb0] sm:$0xff]  ;;  %v243_v48 = vld [vmem:[#allocation2 + $0xc8] sm:$0xff]  ;;  %v245_v49 = vld [vmem:[#allocation2 + $0xd8] sm:$0xff] }
  0xf6   :  { %v284_v50 = vpack.c.bf16 %v240_v47, %v238_v46  ;;  %v287_v51 = vpack.c.bf16 %v245_v49, %v243_v48  ;;  %v242_v52 = vld [vmem:[#allocation2 + $0xc0] sm:$0xff]  ;;  %v244_v53 = vld [vmem:[#allocation2 + $0xd0] sm:$0xff]  ;;  %v247_v54 = vld [vmem:[#allocation2 + $0xe8] sm:$0xff] }
  0xf7   :  { %401 = vmatpush1.bf16.msra.mxu0 %v2642_v4  ;;  %v249_v55 = vld [vmem:[#allocation2 + $0xf8] sm:$0xff]  ;;  %v286_v56 = vpack.c.bf16 %v244_v53, %v242_v52  ;;  %v246_v58 = vld [vmem:[#allocation2 + $0xe0] sm:$0xff]  ;;  %v248_v59 = vld [vmem:[#allocation2 + $0xf0] sm:$0xff] }
  0xf8   :  { %402 = vmatprep.subr.bf16.mxu0 %v3178_v0  ;;  %v289_v57 = vpack.c.bf16 %v249_v55, %v247_v54  ;;  %v288_v60 = vpack.c.bf16 %v248_v59, %v246_v58  ;;  %v3471_v61 = vld [vmem:[#allocation7] ss:$0 sm:$0xff]  ;;  %v3473_v63 = vld [vmem:[#allocation8] sm:$0xff]  ;;  %v3476_v4 = vld [vmem:[#allocation8 + $0x8] sm:$0xff] }
  0xfb   :  { %403 = vmatpush1.bf16.msra.mxu0 %v2643_v8 }
  0xfc   :  { %404 = vmatprep.subr.bf16.mxu0 %v3178_v0 }
  0xff   :  { %405 = vmatpush1.bf16.msra.mxu0 %v2644_v9 }
 0x100   :  { %406 = vmatprep.subr.bf16.mxu0 %v3178_v0 }
 0x103   :  { %407 = vmatpush1.bf16.msra.mxu0 %v2645_v10 }
 0x104   :  { %408 = vmatprep.subr.bf16.mxu0 %v3178_v0 }
 0x107   :  { %409 = vmatpush1.bf16.msra.mxu0 %v2646_v11 }
 0x108   :  { %410 = vmatprep.subr.bf16.mxu0 %v3178_v0 }
 0x10b   :  { %411 = vmatpush1.bf16.msra.mxu0 %v2647_v12 }
 0x10c   :  { %412 = vmatprep.subr.bf16.mxu0 %v3178_v0 }
 0x10f   :  { %413 = vmatpush1.bf16.msra.mxu0 %v2648_v13 }
 0x110   :  { %414 = vmatprep.subr.bf16.mxu0 %v3178_v0 }
 0x113   :  { %415 = vmatpush1.bf16.msra.mxu0 %v2649_v14 }
 0x114   :  { %416 = vmatprep.subr.bf16.mxu0 %v3178_v0 }
 0x117   :  { %417 = vmatpush1.bf16.msra.mxu0 %v2650_v15 }
 0x11a   :  { %427 = vmatmul.mubr.bf16.vlgmr.msra.gmra.mrb[0].mxu0 %v274_v20 }
 0x11b   :  { %2417 = vmatprep.mubr.msk.bf16.mxu0 %vm369_vm0, %v277_v21 }
 0x122   :  { %435 = vmatmul.mubr.bf16.gmra.mrb[4].mxu0 %v276_v26 }
 0x123   :  { %2418 = vmatprep.mubr.msk.bf16.mxu0 %vm369_vm0, %v279_v27 }
 0x12a   :  { %443 = vmatmul.mubr.bf16.gmra.mrb[8].mxu0 %v278_v32 }
 0x12b   :  { %2419 = vmatprep.mubr.msk.bf16.mxu0 %vm369_vm0, %v281_v33 }
 0x132   :  { %451 = vmatmul.mubr.bf16.gmra.mrb[12].mxu0 %v280_v38 }
 0x133   :  { %2420 = vmatprep.mubr.msk.bf16.mxu0 %vm369_vm0, %v283_v39 }
 0x13a   :  { %459 = vmatmul.mubr.bf16.gmra.mrb[16].mxu0 %v282_v44 }
 0x13b   :  { %2421 = vmatprep.mubr.msk.bf16.mxu0 %vm369_vm0, %v285_v45 }
 0x142   :  { %467 = vmatmul.mubr.bf16.gmra.mrb[20].mxu0 %v284_v50 }
 0x143   :  { %2422 = vmatprep.mubr.msk.bf16.mxu0 %vm369_vm0, %v287_v51 }
 0x14a   :  { %475 = vmatmul.mubr.bf16.gmra.mrb[24].mxu0 %v286_v56 }
 0x14b   :  { %2423 = vmatprep.mubr.msk.bf16.mxu0 %vm369_vm0, %v289_v57 }
 0x152   :  { %483 = vmatmul.mubr.bf16.gmra.mrb[28].mxu0 %v288_v60 }
 0x1ed   :  { %v428_v62 = vpop.f32.mrb[0].mxu0 }
 0x1ee   :  { %v429_v1 = vadd.f32 %v3471_v61, %v428_v62  ;;  %v430_v2 = vpop.f32.mrb[1].mxu0 }
 0x1ef   :  { %v431_v3 = vpop.f32.mrb[2].mxu0 }
 0x1f0   :  { %v432_v5 = vadd.f32 %v3471_v61, %v431_v3  ;;  %v433_v6 = vpop.f32.mrb[3].mxu0  ;;  %v3480_v7 = vadd.f32 %v3473_v63, %v429_v1 }
 0x1f2   :  { %v509_v8 = vsel %vm369_vm0, %v3480_v7, 0.0  ;;  %v3485_v9 = vadd.f32 %v3476_v4, %v432_v5 }
 0x1f3   :  { %510 = vadd.xlane.f32.xlu0 %v509_v8 }
 0x1f4   :  { %v512_v13 = vsel %vm369_vm0, %v3485_v9, 0.0 }
 0x1f5   :  { %v436_v10 = vpop.f32.mrb[4].mxu0 }
 0x1f6   :  { %v437_v11 = vadd.f32 %v3471_v61, %v436_v10  ;;  %v438_v12 = vpop.f32.mrb[5].mxu0 }
 0x1f7   :  { %v439_v14 = vpop.f32.mrb[6].mxu0  ;;  %513 = vadd.xlane.f32.xlu0 %v512_v13 }
 0x1f8   :  { %v440_v15 = vadd.f32 %v3471_v61, %v439_v14  ;;  %v441_v16 = vpop.f32.mrb[7].mxu0  ;;  %v3492_v17 = vadd.f32 %v3473_v63, %v437_v11 }
 0x1fa   :  { %v515_v18 = vsel %vm369_vm0, %v3492_v17, 0.0  ;;  %v3497_v19 = vadd.f32 %v3476_v4, %v440_v15 }
 0x1fb   :  { %516 = vadd.xlane.f32.xlu1 %v515_v18 }
 0x1fc   :  { %v518_v23 = vsel %vm369_vm0, %v3497_v19, 0.0 }
 0x1fd   :  { %v444_v20 = vpop.f32.mrb[8].mxu0 }
 0x1fe   :  { %v445_v21 = vadd.f32 %v3471_v61, %v444_v20  ;;  %v446_v22 = vpop.f32.mrb[9].mxu0 }
 0x1ff   :  { %v447_v24 = vpop.f32.mrb[10].mxu0  ;;  %519 = vadd.xlane.f32.xlu1 %v518_v23 }
 0x200   :  { %v448_v25 = vadd.f32 %v3471_v61, %v447_v24  ;;  %v449_v26 = vpop.f32.mrb[11].mxu0  ;;  %v3504_v27 = vadd.f32 %v3473_v63, %v445_v21 }
 0x202   :  { %v521_v28 = vsel %vm369_vm0, %v3504_v27, 0.0  ;;  %v3509_v29 = vadd.f32 %v3476_v4, %v448_v25 }
 0x203   :  { %522 = vadd.xlane.f32.xlu0 %v521_v28 }
 0x204   :  { %v524_v30 = vsel %vm369_vm0, %v3509_v29, 0.0 }
 0x205   :  { %v452_v31 = vpop.f32.mrb[12].mxu0  ;;  %525 = vadd.xlane.f32.xlu1 %v524_v30 }
 0x206   :  { %v453_v32 = vadd.f32 %v3471_v61, %v452_v31  ;;  %v454_v33 = vpop.f32.mrb[13].mxu0 }
 0x207   :  { %v455_v34 = vpop.f32.mrb[14].mxu0 }
 0x208   :  { %v456_v35 = vadd.f32 %v3471_v61, %v455_v34  ;;  %v457_v36 = vpop.f32.mrb[15].mxu0  ;;  %v3516_v37 = vadd.f32 %v3473_v63, %v453_v32 }
 0x20a   :  { %v527_v38 = vsel %vm369_vm0, %v3516_v37, 0.0  ;;  %v3521_v39 = vadd.f32 %v3476_v4, %v456_v35 }
 0x20b   :  { %528 = vadd.xlane.f32.xlu0 %v527_v38 }
 0x20c   :  { %v530_v40 = vsel %vm369_vm0, %v3521_v39, 0.0 }
 0x20d   :  { %v460_v41 = vpop.f32.mrb[16].mxu0  ;;  %531 = vadd.xlane.f32.xlu1 %v530_v40 }
 0x20e   :  { %v461_v42 = vadd.f32 %v3471_v61, %v460_v41  ;;  %v462_v43 = vpop.f32.mrb[17].mxu0 }
 0x20f   :  { %v463_v44 = vpop.f32.mrb[18].mxu0 }
 0x210   :  { %v464_v45 = vadd.f32 %v3471_v61, %v463_v44  ;;  %v465_v46 = vpop.f32.mrb[19].mxu0  ;;  %v3528_v47 = vadd.f32 %v3473_v63, %v461_v42 }
 0x212   :  { %v533_v48 = vsel %vm369_vm0, %v3528_v47, 0.0  ;;  %v3533_v49 = vadd.f32 %v3476_v4, %v464_v45 }
 0x213   :  { %534 = vadd.xlane.f32.xlu0 %v533_v48 }
 0x214   :  { %v536_v50 = vsel %vm369_vm0, %v3533_v49, 0.0 }
 0x215   :  { %v468_v51 = vpop.f32.mrb[20].mxu0  ;;  %537 = vadd.xlane.f32.xlu1 %v536_v50 }
 0x216   :  { %v469_v52 = vadd.f32 %v3471_v61, %v468_v51  ;;  %v470_v53 = vpop.f32.mrb[21].mxu0 }
 0x217   :  { %v471_v54 = vpop.f32.mrb[22].mxu0 }
 0x218   :  { %v472_v55 = vadd.f32 %v3471_v61, %v471_v54  ;;  %v473_v56 = vpop.f32.mrb[23].mxu0  ;;  %v3540_v57 = vadd.f32 %v3473_v63, %v469_v52 }
 0x21a   :  { %v539_v58 = vsel %vm369_vm0, %v3540_v57, 0.0  ;;  %v3545_v59 = vadd.f32 %v3476_v4, %v472_v55 }
 0x21b   :  { %540 = vadd.xlane.f32.xlu0 %v539_v58 }
 0x21c   :  { %v542_v60 = vsel %vm369_vm0, %v3545_v59, 0.0 }
 0x21d   :  { %v476_v62 = vpop.f32.mrb[24].mxu0  ;;  %543 = vadd.xlane.f32.xlu1 %v542_v60 }
 0x21e   :  { %v477_v1 = vadd.f32 %v3471_v61, %v476_v62  ;;  %v478_v2 = vpop.f32.mrb[25].mxu0 }
 0x21f   :  { %v479_v3 = vpop.f32.mrb[26].mxu0 }
 0x220   :  { %v480_v5 = vadd.f32 %v3471_v61, %v479_v3  ;;  %v481_v6 = vpop.f32.mrb[27].mxu0  ;;  %v3552_v8 = vadd.f32 %v3473_v63, %v477_v1 }
 0x222   :  { %v545_v10 = vsel %vm369_vm0, %v3552_v8, 0.0  ;;  %v3557_v11 = vadd.f32 %v3476_v4, %v480_v5 }
 0x223   :  { %546 = vadd.xlane.f32.xlu0 %v545_v10 }
 0x224   :  { %v548_v12 = vsel %vm369_vm0, %v3557_v11, 0.0 }
 0x225   :  { %v484_v13 = vpop.f32.mrb[28].mxu0  ;;  %549 = vadd.xlane.f32.xlu1 %v548_v12 }
 0x226   :  { %v485_v14 = vadd.f32 %v3471_v61, %v484_v13  ;;  %v486_v15 = vpop.f32.mrb[29].mxu0 }
 0x227   :  { %v487_v16 = vpop.f32.mrb[30].mxu0 }
 0x228   :  { %v488_v18 = vadd.f32 %v3471_v61, %v487_v16  ;;  %v489_v20 = vpop.f32.mrb[31].mxu0  ;;  %v3564_v21 = vadd.f32 %v3473_v63, %v485_v14 }
 0x22a   :  { %v551_v22 = vsel %vm369_vm0, %v3564_v21, 0.0  ;;  %v3569_v23 = vadd.f32 %v3476_v4, %v488_v18 }
 0x22b   :  { %552 = vadd.xlane.f32.xlu0 %v551_v22 }
 0x22c   :  { %v554_v24 = vsel %vm369_vm0, %v3569_v23, 0.0 }
 0x22d   :  { %555 = vadd.xlane.f32.xlu1 %v554_v24 }
 0x280   :  { %v511_v25 = vpop.xlane.xlu0 %510 }
 0x281   :  { %v558_v26 = vmul.f32 0.015625, %v511_v25 }
 0x283   :  { %v3574_v28 = vsub.f32 %v3480_v7, %v558_v26 }
 0x284   :  { %v514_v61 = vpop.xlane.xlu0 %513 }
 0x285   :  { %v559_v30 = vmul.f32 0.015625, %v514_v61  ;;  %v590_v63 = vmul.f32 %v3574_v28, %v3574_v28 }
 0x287   :  { %v3579_v31 = vsub.f32 %v3485_v9, %v559_v30  ;;  %v606_v4 = vsel %vm369_vm0, %v590_v63, 0.0 }
 0x288   :  { %v517_v32 = vpop.xlane.xlu1 %516  ;;  %607 = vadd.xlane.f32.xlu0 %v606_v4 }
 0x289   :  { %v560_v33 = vmul.f32 0.015625, %v517_v32  ;;  %v591_v34 = vmul.f32 %v3579_v31, %v3579_v31 }
 0x28b   :  { %v3585_v35 = vsub.f32 %v3492_v17, %v560_v33  ;;  %v609_v7 = vsel %vm369_vm0, %v591_v34, 0.0 }
 0x28c   :  { %v520_v36 = vpop.xlane.xlu1 %519  ;;  %610 = vadd.xlane.f32.xlu1 %v609_v7 }
 0x28d   :  { %v561_v38 = vmul.f32 0.015625, %v520_v36  ;;  %v592_v9 = vmul.f32 %v3585_v35, %v3585_v35 }
 0x28f   :  { %v3591_v40 = vsub.f32 %v3497_v19, %v561_v38  ;;  %v612_v41 = vsel %vm369_vm0, %v592_v9, 0.0 }
 0x290   :  { %613 = vadd.xlane.f32.xlu0 %v612_v41  ;;  %v523_v42 = vpop.xlane.xlu0 %522 }
 0x291   :  { %v562_v43 = vmul.f32 0.015625, %v523_v42  ;;  %v593_v17 = vmul.f32 %v3591_v40, %v3591_v40 }
 0x292   :  { %v526_v44 = vpop.xlane.xlu1 %525 }
 0x293   :  { %v3597_v45 = vsub.f32 %v3504_v27, %v562_v43  ;;  %v563_v46 = vmul.f32 0.015625, %v526_v44  ;;  %v615_v48 = vsel %vm369_vm0, %v593_v17, 0.0 }
 0x294   :  { %616 = vadd.xlane.f32.xlu1 %v615_v48 }
 0x295   :  { %v3601_v50 = vsub.f32 %v3509_v29, %v563_v46  ;;  %v594_v19 = vmul.f32 %v3597_v45, %v3597_v45 }
 0x297   :  { %v618_v51 = vsel %vm369_vm0, %v594_v19, 0.0  ;;  %v595_v52 = vmul.f32 %v3601_v50, %v3601_v50 }
 0x298   :  { %619 = vadd.xlane.f32.xlu0 %v618_v51  ;;  %v529_v53 = vpop.xlane.xlu0 %528 }
 0x299   :  { %v564_v54 = vmul.f32 0.015625, %v529_v53  ;;  %v621_v27 = vsel %vm369_vm0, %v595_v52, 0.0 }
 0x29a   :  { %v532_v55 = vpop.xlane.xlu1 %531  ;;  %622 = vadd.xlane.f32.xlu1 %v621_v27 }
 0x29b   :  { %v3610_v56 = vsub.f32 %v3516_v37, %v564_v54  ;;  %v565_v29 = vmul.f32 0.015625, %v532_v55 }
 0x29d   :  { %v3613_v58 = vsub.f32 %v3521_v39, %v565_v29  ;;  %v596_v60 = vmul.f32 %v3610_v56, %v3610_v56 }
 0x29f   :  { %v624_v62 = vsel %vm369_vm0, %v596_v60, 0.0  ;;  %v597_v1 = vmul.f32 %v3613_v58, %v3613_v58 }
 0x2a0   :  { %625 = vadd.xlane.f32.xlu0 %v624_v62  ;;  %v535_v2 = vpop.xlane.xlu0 %534  ;;  %v3672_v62 = vld [vmem:[#allocation10] sm:$0xff] }
 0x2a1   :  { %v566_v3 = vmul.f32 0.015625, %v535_v2  ;;  %v627_v5 = vsel %vm369_vm0, %v597_v1, 0.0 }
 0x2a2   :  { %v538_v6 = vpop.xlane.xlu1 %537  ;;  %628 = vadd.xlane.f32.xlu1 %v627_v5 }
 0x2a3   :  { %v3622_v37 = vsub.f32 %v3528_v47, %v566_v3  ;;  %v567_v39 = vmul.f32 0.015625, %v538_v6 }
 0x2a5   :  { %v3625_v10 = vsub.f32 %v3533_v49, %v567_v39  ;;  %v598_v12 = vmul.f32 %v3622_v37, %v3622_v37 }
 0x2a7   :  { %v630_v13 = vsel %vm369_vm0, %v598_v12, 0.0  ;;  %v599_v14 = vmul.f32 %v3625_v10, %v3625_v10 }
 0x2a8   :  { %631 = vadd.xlane.f32.xlu0 %v630_v13  ;;  %v541_v15 = vpop.xlane.xlu0 %540 }
 0x2a9   :  { %v568_v16 = vmul.f32 0.015625, %v541_v15  ;;  %v633_v18 = vsel %vm369_vm0, %v599_v14, 0.0 }
 0x2aa   :  { %v544_v20 = vpop.xlane.xlu1 %543  ;;  %634 = vadd.xlane.f32.xlu1 %v633_v18 }
 0x2ab   :  { %v3634_v47 = vsub.f32 %v3540_v57, %v568_v16  ;;  %v569_v49 = vmul.f32 0.015625, %v544_v20 }
 0x2ad   :  { %v3637_v22 = vsub.f32 %v3545_v59, %v569_v49  ;;  %v600_v24 = vmul.f32 %v3634_v47, %v3634_v47 }
 0x2af   :  { %v636_v25 = vsel %vm369_vm0, %v600_v24, 0.0  ;;  %v601_v26 = vmul.f32 %v3637_v22, %v3637_v22 }
 0x2b0   :  { %637 = vadd.xlane.f32.xlu0 %v636_v25  ;;  %v547_v61 = vpop.xlane.xlu0 %546 }
 0x2b1   :  { %v570_v30 = vmul.f32 0.015625, %v547_v61  ;;  %v639_v63 = vsel %vm369_vm0, %v601_v26, 0.0 }
 0x2b2   :  { %v550_v4 = vpop.xlane.xlu1 %549  ;;  %640 = vadd.xlane.f32.xlu1 %v639_v63 }
 0x2b3   :  { %v3646_v57 = vsub.f32 %v3552_v8, %v570_v30  ;;  %v571_v59 = vmul.f32 0.015625, %v550_v4 }
 0x2b5   :  { %v3649_v32 = vsub.f32 %v3557_v11, %v571_v59  ;;  %v602_v33 = vmul.f32 %v3646_v57, %v3646_v57 }
 0x2b7   :  { %v642_v34 = vsel %vm369_vm0, %v602_v33, 0.0  ;;  %v603_v7 = vmul.f32 %v3649_v32, %v3649_v32 }
 0x2b8   :  { %643 = vadd.xlane.f32.xlu0 %v642_v34  ;;  %v553_v36 = vpop.xlane.xlu0 %552 }
 0x2b9   :  { %v572_v38 = vmul.f32 0.015625, %v553_v36  ;;  %v645_v9 = vsel %vm369_vm0, %v603_v7, 0.0 }
 0x2ba   :  { %v556_v41 = vpop.xlane.xlu1 %555  ;;  %646 = vadd.xlane.f32.xlu1 %v645_v9 }
 0x2bb   :  { %v3658_v8 = vsub.f32 %v3564_v21, %v572_v38  ;;  %v573_v11 = vmul.f32 0.015625, %v556_v41  ;;  %v718_v21 = vlaneseq }
 0x2bd   :  { %v3661_v42 = vsub.f32 %v3569_v23, %v573_v11  ;;  %v604_v43 = vmul.f32 %v3658_v8, %v3658_v8  ;;  %v3669_v53 = vshrl.u32 %v718_v21, 7 }
 0x2bf   :  { %v648_v17 = vsel %vm369_vm0, %v604_v43, 0.0  ;;  %v605_v44 = vmul.f32 %v3661_v42, %v3661_v42  ;;  %v720_v29 = vsub.s32 3, %v3669_v53  ;;  %v740_v2 = vsub.s32 4, %v3669_v53 }
 0x2c0   :  { %649 = vadd.xlane.f32.xlu0 %v648_v17 }
 0x2c1   :  { %v651_v46 = vsel %vm369_vm0, %v605_v44, 0.0  ;;  %v3678_v5 = vrot.slane %v3672_v62, %v720_v29  ;;  %v3682_v14 = vrot.slane %v3672_v62, %v740_v2 }
 0x2c2   :  { %652 = vadd.xlane.f32.xlu1 %v651_v46 }
 0x315   :  { %v608_v48 = vpop.xlane.xlu0 %607 }
 0x316   :  { %v654_v19 = vmul.f32 0.015625, %v608_v48 }
 0x318   :  { %v670_v51 = vadd.f32 1e-05, %v654_v19 }
 0x319   :  { %v611_v52 = vpop.xlane.xlu1 %610 }
 0x31a   :  { %2695 = vrsqrt.f32 %v670_v51  ;;  %v655_v23 = vmul.f32 0.015625, %v611_v52 }
 0x31c   :  { %v671_v54 = vadd.f32 1e-05, %v655_v23 }
 0x31d   :  { %v614_v27 = vpop.xlane.xlu0 %613 }
 0x31e   :  { %2697 = vrsqrt.f32 %v671_v54  ;;  %v656_v55 = vmul.f32 0.015625, %v614_v27 }
 0x320   :  { %v672_v60 = vadd.f32 1e-05, %v656_v55 }
 0x321   :  { %v617_v1 = vpop.xlane.xlu1 %616 }
 0x322   :  { %2699 = vrsqrt.f32 %v672_v60  ;;  %v657_v3 = vmul.f32 0.015625, %v617_v1 }
 0x324   :  { %v2696_v6 = vpop.eup %2695  ;;  %v673_v39 = vadd.f32 1e-05, %v657_v3 }
 0x325   :  { %v620_v12 = vpop.xlane.xlu0 %619  ;;  %v702_v13 = vmul.f32 %v2696_v6, %v3574_v28 }
 0x326   :  { %2701 = vrsqrt.f32 %v673_v39  ;;  %v658_v15 = vmul.f32 0.015625, %v620_v12 }
 0x327   :  { %v623_v16 = vpop.xlane.xlu1 %622  ;;  %v722_v18 = vmul.f32 %v3678_v5, %v702_v13 }
 0x328   :  { %v2698_v20 = vpop.eup %2697  ;;  %v674_v49 = vadd.f32 1e-05, %v658_v15  ;;  %v659_v24 = vmul.f32 0.015625, %v623_v16 }
 0x329   :  { %v3686_v25 = vadd.f32 %v3682_v14, %v722_v18  ;;  %v703_v26 = vmul.f32 %v2698_v20, %v3579_v31 }
 0x32a   :  { %2703 = vrsqrt.f32 %v674_v49  ;;  %v675_v61 = vadd.f32 1e-05, %v659_v24 }
 0x32b   :  { %v758_v28 = vsel %vm369_vm0, %v3686_v25, 0.0  ;;  %v723_v30 = vmul.f32 %v3678_v5, %v703_v26 }
 0x32c   :  { %v2700_v63 = vpop.eup %2699  ;;  %2705 = vrsqrt.f32 %v675_v61  ;;  %759 = vadd.xlane.f32.xlu0 %v758_v28 }
 0x32d   :  { %v626_v4 = vpop.xlane.xlu0 %625  ;;  %v3693_v59 = vadd.f32 %v3682_v14, %v723_v30  ;;  %v704_v33 = vmul.f32 %v2700_v63, %v3585_v35 }
 0x32e   :  { %v660_v34 = vmul.f32 0.015625, %v626_v4 }
 0x32f   :  { %v629_v7 = vpop.xlane.xlu1 %628  ;;  %v761_v31 = vsel %vm369_vm0, %v3693_v59, 0.0  ;;  %v724_v36 = vmul.f32 %v3678_v5, %v704_v33 }
 0x330   :  { %v2702_v38 = vpop.eup %2701  ;;  %v676_v9 = vadd.f32 1e-05, %v660_v34  ;;  %v661_v41 = vmul.f32 0.015625, %v629_v7  ;;  %762 = vadd.xlane.f32.xlu1 %v761_v31 }
 0x331   :  { %v3700_v11 = vadd.f32 %v3682_v14, %v724_v36  ;;  %v705_v43 = vmul.f32 %v2702_v38, %v3591_v40 }
 0x332   :  { %2707 = vrsqrt.f32 %v676_v9  ;;  %v677_v17 = vadd.f32 1e-05, %v661_v41 }
 0x333   :  { %v764_v35 = vsel %vm369_vm0, %v3700_v11, 0.0  ;;  %v725_v44 = vmul.f32 %v3678_v5, %v705_v43 }
 0x334   :  { %v2704_v46 = vpop.eup %2703  ;;  %2709 = vrsqrt.f32 %v677_v17  ;;  %765 = vadd.xlane.f32.xlu0 %v764_v35 }
 0x335   :  { %v632_v48 = vpop.xlane.xlu0 %631  ;;  %v3707_v19 = vadd.f32 %v3682_v14, %v725_v44  ;;  %v706_v21 = vmul.f32 %v2704_v46, %v3597_v45 }
 0x336   :  { %v2706_v51 = vpop.eup %2705  ;;  %v662_v52 = vmul.f32 0.015625, %v632_v48 }
 0x337   :  { %v635_v23 = vpop.xlane.xlu1 %634  ;;  %v767_v40 = vsel %vm369_vm0, %v3707_v19, 0.0  ;;  %v726_v54 = vmul.f32 %v3678_v5, %v706_v21  ;;  %v707_v27 = vmul.f32 %v2706_v51, %v3601_v50 }
 0x338   :  { %v678_v55 = vadd.f32 1e-05, %v662_v52  ;;  %v663_v60 = vmul.f32 0.015625, %v635_v23  ;;  %768 = vadd.xlane.f32.xlu1 %v767_v40 }
 0x339   :  { %v3715_v1 = vadd.f32 %v3682_v14, %v726_v54  ;;  %v727_v2 = vmul.f32 %v3678_v5, %v707_v27 }
 0x33a   :  { %2711 = vrsqrt.f32 %v678_v55  ;;  %v679_v45 = vadd.f32 1e-05, %v663_v60 }
 0x33b   :  { %v770_v3 = vsel %vm369_vm0, %v3715_v1, 0.0  ;;  %v3721_v6 = vadd.f32 %v3682_v14, %v727_v2 }
 0x33c   :  { %v2708_v39 = vpop.eup %2707  ;;  %2713 = vrsqrt.f32 %v679_v45  ;;  %771 = vadd.xlane.f32.xlu0 %v770_v3 }
 0x33d   :  { %v638_v50 = vpop.xlane.xlu0 %637  ;;  %v773_v12 = vsel %vm369_vm0, %v3721_v6, 0.0  ;;  %v708_v13 = vmul.f32 %v2708_v39, %v3610_v56 }
 0x33e   :  { %v2710_v15 = vpop.eup %2709  ;;  %v664_v16 = vmul.f32 0.015625, %v638_v50  ;;  %774 = vadd.xlane.f32.xlu1 %v773_v12 }
 0x33f   :  { %v641_v18 = vpop.xlane.xlu1 %640  ;;  %v728_v20 = vmul.f32 %v3678_v5, %v708_v13  ;;  %v709_v49 = vmul.f32 %v2710_v15, %v3613_v58 }
 0x340   :  { %v680_v24 = vadd.f32 1e-05, %v664_v16  ;;  %v665_v26 = vmul.f32 0.015625, %v641_v18 }
 0x341   :  { %v3729_v61 = vadd.f32 %v3682_v14, %v728_v20  ;;  %v729_v28 = vmul.f32 %v3678_v5, %v709_v49 }
 0x342   :  { %2715 = vrsqrt.f32 %v680_v24  ;;  %v681_v30 = vadd.f32 1e-05, %v665_v26 }
 0x343   :  { %v776_v56 = vsel %vm369_vm0, %v3729_v61, 0.0  ;;  %v3735_v63 = vadd.f32 %v3682_v14, %v729_v28 }
 0x344   :  { %v2712_v4 = vpop.eup %2711  ;;  %2717 = vrsqrt.f32 %v681_v30  ;;  %777 = vadd.xlane.f32.xlu0 %v776_v56 }
 0x345   :  { %v644_v33 = vpop.xlane.xlu0 %643  ;;  %v779_v58 = vsel %vm369_vm0, %v3735_v63, 0.0  ;;  %v710_v34 = vmul.f32 %v2712_v4, %v3622_v37 }
 0x346   :  { %v2714_v7 = vpop.eup %2713  ;;  %v666_v31 = vmul.f32 0.015625, %v644_v33  ;;  %780 = vadd.xlane.f32.xlu1 %v779_v58 }
 0x347   :  { %v647_v36 = vpop.xlane.xlu1 %646  ;;  %v730_v38 = vmul.f32 %v3678_v5, %v710_v34  ;;  %v711_v9 = vmul.f32 %v2714_v7, %v3625_v10 }
 0x348   :  { %v682_v41 = vadd.f32 1e-05, %v666_v31  ;;  %v667_v43 = vmul.f32 0.015625, %v647_v36 }
 0x349   :  { %v3743_v17 = vadd.f32 %v3682_v14, %v730_v38  ;;  %v731_v35 = vmul.f32 %v3678_v5, %v711_v9 }
 0x34a   :  { %2719 = vrsqrt.f32 %v682_v41  ;;  %v683_v44 = vadd.f32 1e-05, %v667_v43 }
 0x34b   :  { %v782_v37 = vsel %vm369_vm0, %v3743_v17, 0.0  ;;  %v3749_v46 = vadd.f32 %v3682_v14, %v731_v35 }
 0x34c   :  { %v2716_v48 = vpop.eup %2715  ;;  %2721 = vrsqrt.f32 %v683_v44  ;;  %783 = vadd.xlane.f32.xlu0 %v782_v37 }
 0x34d   :  { %v650_v21 = vpop.xlane.xlu0 %649  ;;  %v785_v10 = vsel %vm369_vm0, %v3749_v46, 0.0  ;;  %v712_v51 = vmul.f32 %v2716_v48, %v3634_v47 }
 0x34e   :  { %v2718_v52 = vpop.eup %2717  ;;  %v668_v23 = vmul.f32 0.015625, %v650_v21  ;;  %786 = vadd.xlane.f32.xlu1 %v785_v10 }
 0x34f   :  { %v653_v40 = vpop.xlane.xlu1 %652  ;;  %v732_v54 = vmul.f32 %v3678_v5, %v712_v51  ;;  %v713_v27 = vmul.f32 %v2718_v52, %v3637_v22 }
 0x350   :  { %v684_v55 = vadd.f32 1e-05, %v668_v23  ;;  %v669_v60 = vmul.f32 0.015625, %v653_v40 }
 0x351   :  { %v3757_v2 = vadd.f32 %v3682_v14, %v732_v54  ;;  %v733_v45 = vmul.f32 %v3678_v5, %v713_v27 }
 0x352   :  { %2723 = vrsqrt.f32 %v684_v55  ;;  %v685_v3 = vadd.f32 1e-05, %v669_v60 }
 0x353   :  { %v788_v47 = vsel %vm369_vm0, %v3757_v2, 0.0  ;;  %v3763_v39 = vadd.f32 %v3682_v14, %v733_v45 }
 0x354   :  { %v2720_v50 = vpop.eup %2719  ;;  %2725 = vrsqrt.f32 %v685_v3  ;;  %789 = vadd.xlane.f32.xlu0 %v788_v47 }
 0x355   :  { %v791_v22 = vsel %vm369_vm0, %v3763_v39, 0.0  ;;  %v714_v12 = vmul.f32 %v2720_v50, %v3646_v57 }
 0x356   :  { %v2722_v13 = vpop.eup %2721  ;;  %792 = vadd.xlane.f32.xlu1 %v791_v22 }
 0x357   :  { %v734_v15 = vmul.f32 %v3678_v5, %v714_v12  ;;  %v715_v16 = vmul.f32 %v2722_v13, %v3649_v32 }
 0x359   :  { %v3771_v18 = vadd.f32 %v3682_v14, %v734_v15  ;;  %v735_v20 = vmul.f32 %v3678_v5, %v715_v16 }
 0x35b   :  { %v794_v49 = vsel %vm369_vm0, %v3771_v18, 0.0  ;;  %v3777_v24 = vadd.f32 %v3682_v14, %v735_v20 }
 0x35c   :  { %v2724_v26 = vpop.eup %2723  ;;  %795 = vadd.xlane.f32.xlu0 %v794_v49 }
 0x35d   :  { %v797_v57 = vsel %vm369_vm0, %v3777_v24, 0.0  ;;  %v716_v28 = vmul.f32 %v2724_v26, %v3658_v8 }
 0x35e   :  { %v2726_v30 = vpop.eup %2725  ;;  %798 = vadd.xlane.f32.xlu1 %v797_v57 }
 0x35f   :  { %v736_v32 = vmul.f32 %v3678_v5, %v716_v28  ;;  %v717_v56 = vmul.f32 %v2726_v30, %v3661_v42 }
 0x361   :  { %v3785_v4 = vadd.f32 %v3682_v14, %v736_v32  ;;  %v737_v33 = vmul.f32 %v3678_v5, %v717_v56 }
 0x363   :  { %v800_v58 = vsel %vm369_vm0, %v3785_v4, 0.0  ;;  %v3791_v34 = vadd.f32 %v3682_v14, %v737_v33  ;;  %v2651_v33 = vld [vmem:[#allocation13] sm:$0xff]  }
 0x364   :  { %801 = vadd.xlane.f32.xlu0 %v800_v58  ;;  %2542 = vmatprep.subr.bf16.mxu1 %v2651_v33 }
 0x365   :  { %v803_v8 = vsel %vm369_vm0, %v3791_v34, 0.0  ;;  %2543 = vmatpush3.bf16.msra.mxu1 %v2651_v33 }
 0x366   :  { %804 = vadd.xlane.f32.xlu1 %v803_v8 }
 0x3b9   :  { %v760_v7 = vpop.xlane.xlu0 %759 }
 0x3ba   :  { %v806_v31 = vmul.f32 0.015625, %v760_v7 }
 0x3bc   :  { %v3796_v42 = vsub.f32 %v3686_v25, %v806_v31 }
 0x3bd   :  { %v763_v36 = vpop.xlane.xlu1 %762 }
 0x3be   :  { %v807_v38 = vmul.f32 0.015625, %v763_v36  ;;  %v838_v5 = vmul.f32 %v3796_v42, %v3796_v42  ;;  %v2652_v36 = vld [vmem:[#allocation13 + $0x8] sm:$0xff]  }
 0x3bf   :  { %2544 = vmatprep.subr.bf16.mxu1 %v2652_v36 }
 0x3c0   :  { %v3801_v9 = vsub.f32 %v3693_v59, %v807_v38  ;;  %v854_v14 = vsel %vm369_vm0, %v838_v5, 0.0  ;;  %2545 = vmatpush3.bf16.msra.mxu1 %v2652_v36 }
 0x3c1   :  { %855 = vadd.xlane.f32.xlu0 %v854_v14  ;;  %v766_v41 = vpop.xlane.xlu0 %765 }
 0x3c2   :  { %v808_v43 = vmul.f32 0.015625, %v766_v41  ;;  %v839_v35 = vmul.f32 %v3801_v9, %v3801_v9 }
 0x3c4   :  { %v3807_v44 = vsub.f32 %v3700_v11, %v808_v43  ;;  %v857_v25 = vsel %vm369_vm0, %v839_v35, 0.0  ;;  %v2653_v43 = vld [vmem:[#allocation13 + $0x10] sm:$0xff]  }
 0x3c5   :  { %858 = vadd.xlane.f32.xlu1 %v857_v25  ;;  %v769_v37 = vpop.xlane.xlu1 %768  ;;  %2546 = vmatprep.subr.bf16.mxu1 %v2653_v43 }
 0x3c6   :  { %v809_v48 = vmul.f32 0.015625, %v769_v37  ;;  %v840_v59 = vmul.f32 %v3807_v44, %v3807_v44  ;;  %2547 = vmatpush3.bf16.msra.mxu1 %v2653_v43 }
 0x3c8   :  { %v3813_v21 = vsub.f32 %v3707_v19, %v809_v48  ;;  %v860_v10 = vsel %vm369_vm0, %v840_v59, 0.0  ;;  %v2654_v59 = vld [vmem:[#allocation13 + $0x18] sm:$0xff]  }
 0x3c9   :  { %861 = vadd.xlane.f32.xlu0 %v860_v10  ;;  %v772_v51 = vpop.xlane.xlu0 %771  ;;  %2548 = vmatprep.subr.bf16.mxu1 %v2654_v59 }
 0x3ca   :  { %v810_v52 = vmul.f32 0.015625, %v772_v51  ;;  %v841_v11 = vmul.f32 %v3813_v21, %v3813_v21  ;;  %2549 = vmatpush3.bf16.msra.mxu1 %v2654_v59 }
 0x3cb   :  { %v775_v23 = vpop.xlane.xlu1 %774 }
 0x3cc   :  { %v3819_v40 = vsub.f32 %v3715_v1, %v810_v52  ;;  %v811_v54 = vmul.f32 0.015625, %v775_v23  ;;  %v863_v27 = vsel %vm369_vm0, %v841_v11, 0.0 }
 0x3cd   :  { %864 = vadd.xlane.f32.xlu1 %v863_v27 }
 0x3ce   :  { %v3823_v55 = vsub.f32 %v3721_v6, %v811_v54  ;;  %v842_v19 = vmul.f32 %v3819_v40, %v3819_v40 }
 0x3d0   :  { %v866_v60 = vsel %vm369_vm0, %v842_v19, 0.0  ;;  %v843_v45 = vmul.f32 %v3823_v55, %v3823_v55 }
 0x3d1   :  { %867 = vadd.xlane.f32.xlu0 %v866_v60  ;;  %v778_v3 = vpop.xlane.xlu0 %777 }
 0x3d2   :  { %v812_v47 = vmul.f32 0.015625, %v778_v3  ;;  %v869_v1 = vsel %vm369_vm0, %v843_v45, 0.0 }
 0x3d3   :  { %870 = vadd.xlane.f32.xlu1 %v869_v1  ;;  %v781_v50 = vpop.xlane.xlu1 %780 }
 0x3d4   :  { %v3832_v22 = vsub.f32 %v3729_v61, %v812_v47  ;;  %v813_v6 = vmul.f32 0.015625, %v781_v50  ;;  %v3891_v50 = vld [vmem:[#allocation11] sm:$0xff]  }
 0x3d5   :  { %2566 = vmatprep.subr.bf16.mxu1 %v3891_v50 }
 0x3d6   :  { %v3835_v12 = vsub.f32 %v3735_v63, %v813_v6  ;;  %v844_v13 = vmul.f32 %v3832_v22, %v3832_v22 }
 0x3d8   :  { %v872_v15 = vsel %vm369_vm0, %v844_v13, 0.0  ;;  %v845_v16 = vmul.f32 %v3835_v12, %v3835_v12 }
 0x3d9   :  { %873 = vadd.xlane.f32.xlu0 %v872_v15  ;;  %v784_v20 = vpop.xlane.xlu0 %783 }
 0x3da   :  { %v814_v49 = vmul.f32 0.015625, %v784_v20  ;;  %v875_v26 = vsel %vm369_vm0, %v845_v16, 0.0 }
 0x3db   :  { %876 = vadd.xlane.f32.xlu1 %v875_v26  ;;  %v787_v61 = vpop.xlane.xlu1 %786 }
 0x3dc   :  { %v3844_v57 = vsub.f32 %v3743_v17, %v814_v49  ;;  %v815_v63 = vmul.f32 0.015625, %v787_v61 }
 0x3de   :  { %v3847_v28 = vsub.f32 %v3749_v46, %v815_v63  ;;  %v846_v30 = vmul.f32 %v3844_v57, %v3844_v57  ;;  %v968_v63 = vsub.s32 5, %v3669_v53 }
 0x3e0   :  { %v878_v32 = vsel %vm369_vm0, %v846_v30, 0.0  ;;  %v847_v56 = vmul.f32 %v3847_v28, %v3847_v28 }
 0x3e1   :  { %879 = vadd.xlane.f32.xlu0 %v878_v32  ;;  %v790_v58 = vpop.xlane.xlu0 %789 }
 0x3e2   :  { %v816_v8 = vmul.f32 0.015625, %v790_v58  ;;  %v881_v7 = vsel %vm369_vm0, %v847_v56, 0.0 }
 0x3e3   :  { %882 = vadd.xlane.f32.xlu1 %v881_v7  ;;  %v793_v17 = vpop.xlane.xlu1 %792  ;;  %v988_v7 = vsub.s32 6, %v3669_v53 }
 0x3e4   :  { %v3856_v46 = vsub.f32 %v3757_v2, %v816_v8  ;;  %v817_v31 = vmul.f32 0.015625, %v793_v17  ;;  %v3897_v8 = vrot.slane %v3672_v62, %v968_v63 }
 0x3e6   :  { %v3859_v38 = vsub.f32 %v3763_v39, %v817_v31  ;;  %v848_v5 = vmul.f32 %v3856_v46, %v3856_v46 }
 0x3e8   :  { %v884_v14 = vsel %vm369_vm0, %v848_v5, 0.0  ;;  %v849_v41 = vmul.f32 %v3859_v38, %v3859_v38 }
 0x3e9   :  { %885 = vadd.xlane.f32.xlu0 %v884_v14  ;;  %v796_v35 = vpop.xlane.xlu0 %795 }
 0x3ea   :  { %v818_v2 = vmul.f32 0.015625, %v796_v35  ;;  %v887_v25 = vsel %vm369_vm0, %v849_v41, 0.0  ;;  %v3903_v35 = vrot.slane %v3672_v62, %v988_v7 }
 0x3eb   :  { %888 = vadd.xlane.f32.xlu1 %v887_v25  ;;  %v799_v39 = vpop.xlane.xlu1 %798 }
 0x3ec   :  { %v3868_v37 = vsub.f32 %v3771_v18, %v818_v2  ;;  %v819_v48 = vmul.f32 0.015625, %v799_v39 }
 0x3ee   :  { %v3871_v10 = vsub.f32 %v3777_v24, %v819_v48  ;;  %v850_v51 = vmul.f32 %v3868_v37, %v3868_v37 }
 0x3f0   :  { %v890_v52 = vsel %vm369_vm0, %v850_v51, 0.0  ;;  %v851_v11 = vmul.f32 %v3871_v10, %v3871_v10 }
 0x3f1   :  { %891 = vadd.xlane.f32.xlu0 %v890_v52  ;;  %v802_v23 = vpop.xlane.xlu0 %801 }
 0x3f2   :  { %v820_v54 = vmul.f32 0.015625, %v802_v23  ;;  %v893_v18 = vsel %vm369_vm0, %v851_v11, 0.0 }
 0x3f3   :  { %894 = vadd.xlane.f32.xlu1 %v893_v18  ;;  %v805_v27 = vpop.xlane.xlu1 %804 }
 0x3f4   :  { %v3880_v24 = vsub.f32 %v3785_v4, %v820_v54  ;;  %v821_v19 = vmul.f32 0.015625, %v805_v27 }
 0x3f6   :  { %v3883_v60 = vsub.f32 %v3791_v34, %v821_v19  ;;  %v852_v45 = vmul.f32 %v3880_v24, %v3880_v24 }
 0x3f8   :  { %v896_v3 = vsel %vm369_vm0, %v852_v45, 0.0  ;;  %v853_v47 = vmul.f32 %v3883_v60, %v3883_v60 }
 0x3f9   :  { %897 = vadd.xlane.f32.xlu0 %v896_v3 }
 0x3fa   :  { %v899_v1 = vsel %vm369_vm0, %v853_v47, 0.0 }
 0x3fb   :  { %900 = vadd.xlane.f32.xlu1 %v899_v1 }
 0x44e   :  { %v856_v4 = vpop.xlane.xlu0 %855 }
 0x44f   :  { %v902_v6 = vmul.f32 0.015625, %v856_v4 }
 0x451   :  { %v918_v34 = vadd.f32 1e-05, %v902_v6 }
 0x452   :  { %v859_v13 = vpop.xlane.xlu1 %858 }
 0x453   :  { %2727 = vrsqrt.f32 %v918_v34  ;;  %v903_v15 = vmul.f32 0.015625, %v859_v13 }
 0x455   :  { %v919_v16 = vadd.f32 1e-05, %v903_v15 }
 0x456   :  { %v862_v20 = vpop.xlane.xlu0 %861 }
 0x457   :  { %2729 = vrsqrt.f32 %v919_v16  ;;  %v904_v49 = vmul.f32 0.015625, %v862_v20 }
 0x459   :  { %v920_v26 = vadd.f32 1e-05, %v904_v49  ;;  %v2656_v49 = vld [vmem:[#allocation11 + $0x8] sm:$0xff]  }
 0x45a   :  { %v865_v61 = vpop.xlane.xlu1 %864 }
 0x45b   :  { %2731 = vrsqrt.f32 %v920_v26  ;;  %v905_v30 = vmul.f32 0.015625, %v865_v61 }
 0x45d   :  { %v2728_v32 = vpop.eup %2727  ;;  %v921_v56 = vadd.f32 1e-05, %v905_v30 }
 0x45e   :  { %v868_v33 = vpop.xlane.xlu0 %867  ;;  %v950_v58 = vmul.f32 %v2728_v32, %v3796_v42  ;;  %v2657_v32 = vld [vmem:[#allocation11 + $0x10] sm:$0xff]  }
 0x45f   :  { %2733 = vrsqrt.f32 %v921_v56  ;;  %v906_v17 = vmul.f32 0.015625, %v868_v33 }
 0x460   :  { %v871_v31 = vpop.xlane.xlu1 %870  ;;  %v970_v43 = vmul.f32 %v3897_v8, %v950_v58 }
 0x461   :  { %v2730_v36 = vpop.eup %2729  ;;  %v922_v5 = vadd.f32 1e-05, %v906_v17  ;;  %v907_v14 = vmul.f32 0.015625, %v871_v31 }
 0x462   :  { %v951_v41 = vmul.f32 %v2730_v36, %v3801_v9  ;;  %v990_v59 = vadd.f32 %v3903_v35, %v970_v43 }
 0x463   :  { %2735 = vrsqrt.f32 %v922_v5  ;;  %v923_v42 = vadd.f32 1e-05, %v907_v14  ;;  %v2658_v14 = vld [vmem:[#allocation11 + $0x18] sm:$0xff]  }
 0x464   :  { %v971_v2 = vmul.f32 %v3897_v8, %v951_v41 }
 0x465   :  { %v2732_v25 = vpop.eup %2731  ;;  %2737 = vrsqrt.f32 %v923_v42 }
 0x466   :  { %v952_v39 = vmul.f32 %v2732_v25, %v3807_v44  ;;  %v874_v48 = vpop.xlane.xlu0 %873  ;;  %v991_v51 = vadd.f32 %v3903_v35, %v971_v2 }
 0x467   :  { %v908_v52 = vmul.f32 0.015625, %v874_v48 }
 0x468   :  { %v877_v9 = vpop.xlane.xlu1 %876  ;;  %v3909_v11 = vpack.c.bf16 %v991_v51, %v990_v59  ;;  %v972_v19 = vmul.f32 %v3897_v8, %v952_v39 }
 0x469   :  { %v2734_v23 = vpop.eup %2733  ;;  %v924_v54 = vadd.f32 1e-05, %v908_v52  ;;  %v909_v18 = vmul.f32 0.015625, %v877_v9 }
 0x46a   :  { %v953_v27 = vmul.f32 %v2734_v23, %v3813_v21  ;;  %2550 = vmatprep.mubr.msk.bf16.mxu1 %vm369_vm0, %v3909_v11  ;;  %v992_v4 = vadd.f32 %v3903_v35, %v972_v19 }
 0x46b   :  { %2739 = vrsqrt.f32 %v924_v54  ;;  %v925_v44 = vadd.f32 1e-05, %v909_v18 }
 0x46c   :  { %v973_v45 = vmul.f32 %v3897_v8, %v953_v27 }
 0x46d   :  { %v2736_v3 = vpop.eup %2735  ;;  %2741 = vrsqrt.f32 %v925_v44 }
 0x46e   :  { %v954_v47 = vmul.f32 %v2736_v3, %v3819_v40  ;;  %v880_v1 = vpop.xlane.xlu0 %879  ;;  %v993_v6 = vadd.f32 %v3903_v35, %v973_v45 }
 0x46f   :  { %v2738_v34 = vpop.eup %2737  ;;  %v910_v21 = vmul.f32 0.015625, %v880_v1 }
 0x470   :  { %v955_v13 = vmul.f32 %v2738_v34, %v3823_v55  ;;  %v883_v15 = vpop.xlane.xlu1 %882  ;;  %v3920_v16 = vpack.c.bf16 %v993_v6, %v992_v4  ;;  %v974_v20 = vmul.f32 %v3897_v8, %v954_v47 }
 0x471   :  { %v926_v26 = vadd.f32 1e-05, %v910_v21  ;;  %v911_v61 = vmul.f32 0.015625, %v883_v15 }
 0x472   :  { %2551 = vmatmul.mubr.msk.bf16.vlgmr.msra.gmra.mrb[0].mxu1 %vm369_vm0, %v3920_v16  ;;  %v975_v40 = vmul.f32 %v3897_v8, %v955_v13  ;;  %v994_v30 = vadd.f32 %v3903_v35, %v974_v20 }
 0x473   :  { %2743 = vrsqrt.f32 %v926_v26  ;;  %v927_v63 = vadd.f32 1e-05, %v911_v61  ;;  %2567 = vmatpush3.bf16.msra.mxu1 %v3891_v50 }
 0x474   :  { %v995_v55 = vadd.f32 %v3903_v35, %v975_v40  ;;  %2568 = vmatprep.subr.bf16.mxu1 %v2656_v49 }
 0x475   :  { %v2740_v56 = vpop.eup %2739  ;;  %2745 = vrsqrt.f32 %v927_v63 }
 0x476   :  { %v956_v33 = vmul.f32 %v2740_v56, %v3832_v22  ;;  %v886_v58 = vpop.xlane.xlu0 %885  ;;  %v3930_v7 = vpack.c.bf16 %v995_v55, %v994_v30 }
 0x477   :  { %v2742_v17 = vpop.eup %2741  ;;  %v912_v31 = vmul.f32 0.015625, %v886_v58  ;;  %2569 = vmatpush3.bf16.msra.mxu1 %v2656_v49 }
 0x478   :  { %v957_v36 = vmul.f32 %v2742_v17, %v3835_v12  ;;  %v889_v5 = vpop.xlane.xlu1 %888  ;;  %2554 = vmatprep.mubr.msk.bf16.mxu1 %vm369_vm0, %v3930_v7  ;;  %v976_v50 = vmul.f32 %v3897_v8, %v956_v33  ;;  %2570 = vmatprep.subr.bf16.mxu1 %v2657_v32 }
 0x479   :  { %v928_v41 = vadd.f32 1e-05, %v912_v31  ;;  %v913_v43 = vmul.f32 0.015625, %v889_v5 }
 0x47a   :  { %v977_v22 = vmul.f32 %v3897_v8, %v957_v36  ;;  %v996_v2 = vadd.f32 %v3903_v35, %v976_v50 }
 0x47b   :  { %2747 = vrsqrt.f32 %v928_v41  ;;  %v929_v42 = vadd.f32 1e-05, %v913_v43  ;;  %2571 = vmatpush3.bf16.msra.mxu1 %v2657_v32 }
 0x47c   :  { %v997_v25 = vadd.f32 %v3903_v35, %v977_v22  ;;  %2572 = vmatprep.subr.bf16.mxu1 %v2658_v14 }
 0x47d   :  { %v2744_v12 = vpop.eup %2743  ;;  %2749 = vrsqrt.f32 %v929_v42 }
 0x47e   :  { %v958_v39 = vmul.f32 %v2744_v12, %v3844_v57  ;;  %v892_v48 = vpop.xlane.xlu0 %891  ;;  %v1017_v59 = vpack.c.bf16 %v997_v25, %v996_v2 }
 0x47f   :  { %v2746_v51 = vpop.eup %2745  ;;  %v914_v52 = vmul.f32 0.015625, %v892_v48  ;;  %2573 = vmatpush3.bf16.msra.mxu1 %v2658_v14 }
 0x480   :  { %v959_v9 = vmul.f32 %v2746_v51, %v3847_v28  ;;  %v895_v23 = vpop.xlane.xlu1 %894  ;;  %2555 = vmatmul.mubr.msk.bf16.gmra.mrb[4].mxu1 %vm369_vm0, %v1017_v59  ;;  %v978_v54 = vmul.f32 %v3897_v8, %v958_v39 }
 0x481   :  { %v930_v18 = vadd.f32 1e-05, %v914_v52  ;;  %v915_v27 = vmul.f32 0.015625, %v895_v23 }
 0x482   :  { %v979_v19 = vmul.f32 %v3897_v8, %v959_v9  ;;  %v998_v57 = vadd.f32 %v3903_v35, %v978_v54 }
 0x483   :  { %2751 = vrsqrt.f32 %v930_v18  ;;  %v931_v44 = vadd.f32 1e-05, %v915_v27 }
 0x484   :  { %v999_v45 = vadd.f32 %v3903_v35, %v979_v19 }
 0x485   :  { %v2748_v3 = vpop.eup %2747  ;;  %2753 = vrsqrt.f32 %v931_v44 }
 0x486   :  { %v960_v47 = vmul.f32 %v2748_v3, %v3856_v46  ;;  %v898_v28 = vpop.xlane.xlu0 %897  ;;  %v1018_v1 = vpack.c.bf16 %v999_v45, %v998_v57 }
 0x487   :  { %v2750_v4 = vpop.eup %2749  ;;  %v916_v6 = vmul.f32 0.015625, %v898_v28 }
 0x488   :  { %v961_v34 = vmul.f32 %v2750_v4, %v3859_v38  ;;  %v901_v21 = vpop.xlane.xlu1 %900  ;;  %2558 = vmatprep.mubr.msk.bf16.mxu1 %vm369_vm0, %v1018_v1  ;;  %v980_v13 = vmul.f32 %v3897_v8, %v960_v47 }
 0x489   :  { %v932_v15 = vadd.f32 1e-05, %v916_v6  ;;  %v917_v20 = vmul.f32 0.015625, %v901_v21 }
 0x48a   :  { %v981_v49 = vmul.f32 %v3897_v8, %v961_v34  ;;  %v1000_v61 = vadd.f32 %v3903_v35, %v980_v13 }
 0x48b   :  { %2755 = vrsqrt.f32 %v932_v15  ;;  %v933_v26 = vadd.f32 1e-05, %v917_v20 }
 0x48c   :  { %v1001_v46 = vadd.f32 %v3903_v35, %v981_v49 }
 0x48d   :  { %v2752_v40 = vpop.eup %2751  ;;  %2757 = vrsqrt.f32 %v933_v26 }
 0x48e   :  { %v962_v63 = vmul.f32 %v2752_v40, %v3868_v37  ;;  %v1019_v38 = vpack.c.bf16 %v1001_v46, %v1000_v61 }
 0x48f   :  { %v2754_v30 = vpop.eup %2753 }
 0x490   :  { %v963_v55 = vmul.f32 %v2754_v30, %v3871_v10  ;;  %2559 = vmatmul.mubr.msk.bf16.gmra.mrb[8].mxu1 %vm369_vm0, %v1019_v38  ;;  %v982_v32 = vmul.f32 %v3897_v8, %v962_v63 }
 0x492   :  { %v983_v56 = vmul.f32 %v3897_v8, %v963_v55  ;;  %v1002_v33 = vadd.f32 %v3903_v35, %v982_v32 }
 0x494   :  { %v1003_v58 = vadd.f32 %v3903_v35, %v983_v56 }
 0x495   :  { %v2756_v17 = vpop.eup %2755 }
 0x496   :  { %v964_v31 = vmul.f32 %v2756_v17, %v3880_v24  ;;  %v1020_v36 = vpack.c.bf16 %v1003_v58, %v1002_v33  ;;  %v4044_v58 = vsub.s32 2, %v3669_v53 }
 0x497   :  { %v2758_v5 = vpop.eup %2757 }
 0x498   :  { %v965_v37 = vmul.f32 %v2758_v5, %v3883_v60  ;;  %2562 = vmatprep.mubr.msk.bf16.mxu1 %vm369_vm0, %v1020_v36  ;;  %v984_v10 = vmul.f32 %v3897_v8, %v964_v31 }
 0x49a   :  { %v985_v50 = vmul.f32 %v3897_v8, %v965_v37  ;;  %v1004_v14 = vadd.f32 %v3903_v35, %v984_v10 }
 0x49c   :  { %v1005_v41 = vadd.f32 %v3903_v35, %v985_v50 }
 0x49e   :  { %v1021_v43 = vpack.c.bf16 %v1005_v41, %v1004_v14 }
 0x4a0   :  { %2563 = vmatmul.mubr.msk.bf16.gmra.mrb[12].mxu1 %vm369_vm0, %v1021_v43 }
 0x4a1   :  { %2574 = vmatprep.mubr.msk.bf16.mxu1 %vm369_vm0, %v3909_v11 }
 0x4a8   :  { %2575 = vmatmul.mubr.msk.bf16.vlgmr.msra.gmra.mrb[16].mxu1 %vm369_vm0, %v3920_v16 }
 0x4a9   :  { %2578 = vmatprep.mubr.msk.bf16.mxu1 %vm369_vm0, %v3930_v7 }
 0x4b0   :  { %2579 = vmatmul.mubr.msk.bf16.gmra.mrb[20].mxu1 %vm369_vm0, %v1017_v59 }
 0x4b1   :  { %2582 = vmatprep.mubr.msk.bf16.mxu1 %vm369_vm0, %v1018_v1 }
 0x4b8   :  { %2583 = vmatmul.mubr.msk.bf16.gmra.mrb[24].mxu1 %vm369_vm0, %v1019_v38 }
 0x4b9   :  { %2586 = vmatprep.mubr.msk.bf16.mxu1 %vm369_vm0, %v1020_v36 }
 0x4c0   :  { %2587 = vmatmul.mubr.msk.bf16.gmra.mrb[28].mxu1 %vm369_vm0, %v1021_v43 }
 0x545   :  { %v3979_v24 = vpop.f32.mrb[0].mxu1 }
 0x546   :  { %v3981_v60 = vpop.f32.mrb[1].mxu1 }
 0x547   :  { %v3983_v8 = vpop.f32.mrb[2].mxu1 }
 0x548   :  { %v3985_v35 = vpop.f32.mrb[3].mxu1 }
 0x553   :  { %v3987_v11 = vpop.f32.mrb[4].mxu1 }
 0x554   :  { %v3989_v16 = vpop.f32.mrb[5].mxu1 }
 0x555   :  { %v3991_v7 = vpop.f32.mrb[6].mxu1 }
 0x556   :  { %v3993_v22 = vpop.f32.mrb[7].mxu1 }
 0x563   :  { %v3995_v42 = vpop.f32.mrb[8].mxu1 }
 0x564   :  { %v3997_v2 = vpop.f32.mrb[9].mxu1 }
 0x565   :  { %v3999_v25 = vpop.f32.mrb[10].mxu1 }
 0x566   :  { %v4001_v12 = vpop.f32.mrb[11].mxu1 }
 0x573   :  { %v4003_v39 = vpop.f32.mrb[12].mxu1 }
 0x574   :  { %v4005_v48 = vpop.f32.mrb[13].mxu1 }
 0x575   :  { %v4007_v59 = vpop.f32.mrb[14].mxu1 }
 0x576   :  { %v4009_v51 = vpop.f32.mrb[15].mxu1 }
 0x57b   :  { %v4011_v52 = vpop.f32.mrb[16].mxu1 }
 0x57c   :  { %v4013_v9 = vpop.f32.mrb[17].mxu1  ;;  %v1310_v54 = vsel %vm1300_vm1, %v4011_v52, -inf }
 0x57d   :  { %v4015_v23 = vpop.f32.mrb[18].mxu1  ;;  %v1301_v19 = vsel %vm1300_vm1, %v4013_v9, -inf }
 0x57e   :  { %v1311_v18 = vsel %vm1300_vm1, %v4015_v23, -inf  ;;  %v4021_v27 = vpop.f32.mrb[19].mxu1 }
 0x57f   :  { %v1312_v44 = vmax.f32 %v1310_v54, %v1311_v18  ;;  %v1302_v57 = vsel %vm1300_vm1, %v4021_v27, -inf }
 0x580   :  { %v1303_v45 = vmax.f32 %v1301_v19, %v1302_v57 }
 0x581   :  { %v1313_v3 = vrot.slane %v1312_v44, 4 }
 0x582   :  { %v1304_v47 = vrot.slane %v1303_v45, 4 }
 0x583   :  { %v1314_v28 = vmax.f32 %v1312_v44, %v1313_v3  ;;  %v4027_v1 = vpop.f32.mrb[20].mxu1 }
 0x584   :  { %v1305_v4 = vmax.f32 %v1303_v45, %v1304_v47  ;;  %v4029_v6 = vpop.f32.mrb[21].mxu1  ;;  %v1328_v15 = vsel %vm1300_vm1, %v4027_v1, -inf }
 0x585   :  { %v1315_v34 = vrot.slane %v1314_v28, 2  ;;  %v4031_v21 = vpop.f32.mrb[22].mxu1  ;;  %v1319_v61 = vsel %vm1300_vm1, %v4029_v6, -inf }
 0x586   :  { %v1306_v13 = vrot.slane %v1305_v4, 2  ;;  %v1329_v20 = vsel %vm1300_vm1, %v4031_v21, -inf  ;;  %v4037_v49 = vpop.f32.mrb[23].mxu1 }
 0x587   :  { %v1316_v26 = vmax.f32 %v1314_v28, %v1315_v34  ;;  %v1330_v46 = vmax.f32 %v1328_v15, %v1329_v20  ;;  %v1320_v40 = vsel %vm1300_vm1, %v4037_v49, -inf }
 0x588   :  { %v1307_v63 = vmax.f32 %v1305_v4, %v1306_v13  ;;  %v1321_v38 = vmax.f32 %v1319_v61, %v1320_v40 }
 0x589   :  { %v1317_v30 = vrot.slane %v1316_v26, 1  ;;  %v1331_v55 = vrot.slane %v1330_v46, 4 }
 0x58a   :  { %v1308_v32 = vrot.slane %v1307_v63, 1  ;;  %v1322_v56 = vrot.slane %v1321_v38, 4 }
 0x58b   :  { %v1318_v33 = vmax.f32 %v1316_v26, %v1317_v30  ;;  %v1332_v17 = vmax.f32 %v1330_v46, %v1331_v55  ;;  %v4046_v31 = vpop.f32.mrb[24].mxu1 }
 0x58c   :  { %v1309_v36 = vmax.f32 %v1307_v63, %v1308_v32  ;;  %v1323_v5 = vmax.f32 %v1321_v38, %v1322_v56  ;;  %v4048_v37 = vpop.f32.mrb[25].mxu1  ;;  %v1346_v14 = vsel %vm1300_vm1, %v4046_v31, -inf }
 0x58d   :  { %v1374_v10 = vmax.f32 %v1318_v33, %v3672_v62  ;;  %v1333_v50 = vrot.slane %v1332_v17, 2  ;;  %v4053_v41 = vpop.f32.mrb[26].mxu1  ;;  %v1337_v18 = vsel %vm1300_vm1, %v4048_v37, -inf }
 0x58e   :  { %v1373_v43 = vmax.f32 %v1309_v36, %v3672_v62  ;;  %v1324_v54 = vrot.slane %v1323_v5, 2  ;;  %v1347_v19 = vsel %vm1300_vm1, %v4053_v41, -inf  ;;  %v4060_v44 = vpop.f32.mrb[27].mxu1 }
 0x58f   :  { %v1388_v57 = vrot.slane %v1374_v10, %v4044_v58  ;;  %v1462_v45 = vsub.f32 %v3672_v62, %v1374_v10  ;;  %v1334_v3 = vmax.f32 %v1332_v17, %v1333_v50  ;;  %v1348_v47 = vmax.f32 %v1346_v14, %v1347_v19 }
 0x590   :  { %v1384_v28 = vrot.slane %v1373_v43, %v4044_v58  ;;  %v1461_v4 = vsub.f32 %v3672_v62, %v1373_v43  ;;  %v1325_v34 = vmax.f32 %v1323_v5, %v1324_v54  ;;  %v1338_v13 = vsel %vm1300_vm1, %v4060_v44, -inf }
 0x591   :  { %v1415_v15 = vsub.f32 %v4011_v52, %v1388_v57  ;;  %v1416_v20 = vsub.f32 %v4015_v23, %v1388_v57  ;;  %v1471_v26 = vmul.f32 1.442695, %v1462_v45  ;;  %v1335_v61 = vrot.slane %v1334_v3, 1  ;;  %v4076_v23 = vld [vmem:[#allocation10] sm:$0xff] }
 0x592   :  { %v1413_v46 = vsub.f32 %v4013_v9, %v1384_v28  ;;  %v1414_v40 = vsub.f32 %v4021_v27, %v1384_v28  ;;  %v1469_v63 = vmul.f32 1.442695, %v1461_v4  ;;  %v1326_v38 = vrot.slane %v1325_v34, 1 }
 0x593   :  { %v1433_v30 = vmul.f32 1.442695, %v1415_v15  ;;  %v1435_v55 = vmul.f32 1.442695, %v1416_v20  ;;  %2759 = vpow2.f32 %v1471_v26  ;;  %v1336_v62 = vmax.f32 %v1334_v3, %v1335_v61  ;;  %v4072_v32 = vpop.f32.mrb[28].mxu1 }
 0x594   :  { %v1429_v56 = vmul.f32 1.442695, %v1413_v46  ;;  %v1431_v33 = vmul.f32 1.442695, %v1414_v40  ;;  %2761 = vpow2.f32 %v1469_v63  ;;  %v1327_v52 = vmax.f32 %v1325_v34, %v1326_v38  ;;  %v4074_v17 = vpop.f32.mrb[29].mxu1 }
 0x595   :  { %2763 = vpow2.f32 %v1433_v30  ;;  %v1376_v9 = vmax.f32 %v1336_v62, %v4076_v23  ;;  %v1349_v27 = vrot.slane %v1348_v47, 4  ;;  %v1339_v36 = vmax.f32 %v1337_v18, %v1338_v13  ;;  %v4079_v5 = vpop.f32.mrb[30].mxu1 }
 0x596   :  { %2765 = vpow2.f32 %v1435_v55  ;;  %v1375_v10 = vmax.f32 %v1327_v52, %v4076_v23  ;;  %v4082_v50 = vpop.f32.mrb[31].mxu1  ;;  %v1364_v54 = vsel %vm1300_vm1, %v4072_v32, -inf  ;;  %v1355_v4 = vsel %vm1300_vm1, %v4074_v17, -inf }
 0x597   :  { %2767 = vpow2.f32 %v1429_v56  ;;  %v1396_v14 = vrot.slane %v1376_v9, %v4044_v58  ;;  %v1350_v43 = vmax.f32 %v1348_v47, %v1349_v27  ;;  %v1340_v18 = vrot.slane %v1339_v36, 4 }
 0x598   :  { %2769 = vpow2.f32 %v1431_v33  ;;  %v1392_v19 = vrot.slane %v1375_v10, %v4044_v58  ;;  %v1463_v57 = vsub.f32 %v4076_v23, %v1375_v10  ;;  %v1464_v61 = vsub.f32 %v4076_v23, %v1376_v9 }
 0x599   :  { %v1419_v45 = vsub.f32 %v4027_v1, %v1396_v14  ;;  %v1420_v3 = vsub.f32 %v4031_v21, %v1396_v14  ;;  %v1351_v28 = vrot.slane %v1350_v43, 2  ;;  %v1341_v15 = vmax.f32 %v1339_v36, %v1340_v18 }
 0x59a   :  { %v1417_v34 = vsub.f32 %v4029_v6, %v1392_v19  ;;  %v1418_v47 = vsub.f32 %v4037_v49, %v1392_v19  ;;  %v1473_v13 = vmul.f32 1.442695, %v1463_v57  ;;  %v1365_v6 = vsel %vm1300_vm1, %v4079_v5, -inf }
 0x59b   :  { %v1441_v20 = vmul.f32 1.442695, %v1419_v45  ;;  %v1443_v26 = vmul.f32 1.442695, %v1420_v3  ;;  %v1352_v46 = vmax.f32 %v1350_v43, %v1351_v28  ;;  %v1342_v1 = vrot.slane %v1341_v15, 2 }
 0x59c   :  { %v1437_v40 = vmul.f32 1.442695, %v1417_v34  ;;  %v1439_v63 = vmul.f32 1.442695, %v1418_v47  ;;  %2771 = vpow2.f32 %v1473_v13  ;;  %v1356_v49 = vsel %vm1300_vm1, %v4082_v50, -inf }
 0x59d   :  { %v4096_v21 = vpop.eup %2759  ;;  %2773 = vpow2.f32 %v1441_v20  ;;  %v1353_v38 = vrot.slane %v1352_v46, 1  ;;  %v1343_v55 = vmax.f32 %v1341_v15, %v1342_v1  ;;  %v1366_v62 = vmax.f32 %v1364_v54, %v1365_v6 }
 0x59e   :  { %v4102_v30 = vpop.eup %2761  ;;  %2775 = vpow2.f32 %v1443_v26  ;;  %v1357_v56 = vmax.f32 %v1355_v4, %v1356_v49  ;;  %1740 = vperm.xlu0 %2637, %v4096_v21   ;;  %v1475_v52 = vmul.f32 1.442695, %v1464_v61 }
 0x59f   :  { %v2764_v33 = vpop.eup %2763  ;;  %2777 = vpow2.f32 %v1437_v40  ;;  %v1354_v9 = vmax.f32 %v1352_v46, %v1353_v38  ;;  %1735 = vperm.xlu1 %2638, %v4102_v30   ;;  %v1344_v10 = vrot.slane %v1343_v55, 1  ;;  %v1367_v14 = vrot.slane %v1366_v62, 4 }
 0x5a0   :  { %v2766_v27 = vpop.eup %2765  ;;  %v1494_v36 = vsel %vm1300_vm1, %v2764_v33, 0.0  ;;  %2779 = vpow2.f32 %v1439_v63  ;;  %v1358_v57 = vrot.slane %v1357_v56, 4 }
 0x5a1   :  { %v2768_v43 = vpop.eup %2767  ;;  %v1495_v19 = vsel %vm1300_vm1, %v2766_v27, 0.0  ;;  %v1378_v54 = vmax.f32 %v1354_v9, %v4076_v23  ;;  %v1345_v28 = vmax.f32 %v1343_v55, %v1344_v10  ;;  %v1368_v4 = vmax.f32 %v1366_v62, %v1367_v14 }
 0x5a2   :  { %v2770_v18 = vpop.eup %2769  ;;  %v1496_v45 = vadd.f32 %v1495_v19, %v1494_v36  ;;  %v1485_v3 = vsel %vm1300_vm1, %v2768_v43, 0.0  ;;  %1567 = vperm.xlu0 %2637, %v2768_v43   ;;  %v1359_v15 = vmax.f32 %v1357_v56, %v1358_v57  ;;  %2781 = vpow2.f32 %v1475_v52 }
 0x5a3   :  { %v1486_v34 = vsel %vm1300_vm1, %v2770_v18, 0.0  ;;  %v1404_v47 = vrot.slane %v1378_v54, %v4044_v58  ;;  %v1466_v13 = vsub.f32 %v4076_v23, %v1378_v54  ;;  %1577 = vperm.xlu1 %2638, %v2764_v33   ;;  %v4114_v61 = vmax.f32 %v1345_v28, %v4076_v23 }
 0x5a4   :  { %v1497_v20 = vrot.slane %v1496_v45, 4  ;;  %v1487_v26 = vadd.f32 %v1486_v34, %v1485_v3  ;;  %v1369_v1 = vrot.slane %v1368_v4, 2  ;;  %v1360_v52 = vrot.slane %v1359_v15, 2 }
 0x5a5   :  { %v1423_v46 = vsub.f32 %v4046_v31, %v1404_v47  ;;  %v1424_v40 = vsub.f32 %v4053_v41, %v1404_v47  ;;  %v1479_v63 = vmul.f32 1.442695, %v1466_v13  ;;  %v1400_v55 = vrot.slane %v4114_v61, %v4044_v58 }
 0x5a6   :  { %v4118_v38 = vpop.eup %2771  ;;  %v1498_v6 = vadd.f32 %v1497_v20, %v1496_v45  ;;  %v1488_v49 = vrot.slane %v1487_v26, 4  ;;  %v1370_v54 = vmax.f32 %v1368_v4, %v1369_v1 }
 0x5a7   :  { %v2774_v62 = vpop.eup %2773  ;;  %v1449_v56 = vmul.f32 1.442695, %v1423_v46  ;;  %v1451_v33 = vmul.f32 1.442695, %v1424_v40  ;;  %2783 = vpow2.f32 %v1479_v63  ;;  %1582 = vperm.xlu1 %2638, %v2766_v27   ;;  %1745 = vperm.xlu0 %2637, %v4118_v38   ;;  %v1421_v10 = vsub.f32 %v4048_v37, %v1400_v55 }
 0x5a8   :  { %v4123_v31 = vpop.eup %2775  ;;  %v1499_v41 = vrot.slane %v1498_v6, 2  ;;  %v1489_v9 = vadd.f32 %v1488_v49, %v1487_v26  ;;  %v1512_v36 = vsel %vm1300_vm1, %v2774_v62, 0.0  ;;  %v1422_v19 = vsub.f32 %v4060_v44, %v1400_v55 }
 0x5a9   :  { %v4127_v14 = vpop.eup %2777  ;;  %v1513_v43 = vsel %vm1300_vm1, %v4123_v31, 0.0  ;;  %2785 = vpow2.f32 %v1449_v56  ;;  %v1445_v34 = vmul.f32 1.442695, %v1421_v10  ;;  %v1371_v4 = vrot.slane %v1370_v54, 1 }
 0x5aa   :  { %v4132_v27 = vpop.eup %2779  ;;  %v1500_v57 = vadd.f32 %v1499_v41, %v1498_v6  ;;  %v1490_v45 = vrot.slane %v1489_v9, 2  ;;  %v1514_v3 = vadd.f32 %v1513_v43, %v1512_v36  ;;  %v1503_v28 = vsel %vm1300_vm1, %v4127_v14, 0.0 }
 0x5ab   :  { %v1504_v37 = vsel %vm1300_vm1, %v4132_v27, 0.0  ;;  %2787 = vpow2.f32 %v1451_v33  ;;  %v1447_v47 = vmul.f32 1.442695, %v1422_v19  ;;  %1572 = vperm.xlu1 %2638, %v2770_v18   ;;  %v1361_v46 = vmax.f32 %v1359_v15, %v1360_v52 }
 0x5ac   :  { %v1501_v13 = vrot.slane %v1500_v57, 1  ;;  %v1491_v20 = vadd.f32 %v1490_v45, %v1489_v9  ;;  %v1515_v26 = vrot.slane %v1514_v3, 4  ;;  %v1505_v44 = vadd.f32 %v1504_v37, %v1503_v28  ;;  %v2782_v40 = vpop.eup %2781 }
 0x5ad   :  { %2789 = vpow2.f32 %v1445_v34  ;;  %v1465_v55 = vsub.f32 %v4076_v23, %v4114_v61  ;;  %v1372_v56 = vmax.f32 %v1370_v54, %v1371_v4  ;;  %v1362_v33 = vrot.slane %v1361_v46, 1 }
 0x5ae   :  { %v1502_v63 = vadd.f32 %v1501_v13, %v1500_v57  ;;  %v1492_v1 = vrot.slane %v1491_v20, 1  ;;  %v1516_v6 = vadd.f32 %v1515_v26, %v1514_v3  ;;  %v1506_v49 = vrot.slane %v1505_v44, 4 }
 0x5af   :  { %2791 = vpow2.f32 %v1447_v47  ;;  %1750 = vperm.xlu1 %2638, %v2782_v40   ;;  %v1380_v15 = vmax.f32 %v1372_v56, %v4076_v23  ;;  %v1363_v52 = vmax.f32 %v1361_v46, %v1362_v33  ;;  %v1477_v54 = vmul.f32 1.442695, %v1465_v55 }
 0x5b0   :  { %v4141_v18 = vadd.f32 %v4096_v21, %v1502_v63  ;;  %v1493_v41 = vadd.f32 %v1492_v1, %v1491_v20  ;;  %v1517_v9 = vrot.slane %v1516_v6, 2  ;;  %v1507_v36 = vadd.f32 %v1506_v49, %v1505_v44 }
 0x5b1   :  { %v4143_v10 = vpop.eup %2783  ;;  %v1412_v21 = vrot.slane %v1380_v15, %v4044_v58  ;;  %v4154_v45 = vmax.f32 %v1363_v52, %v4076_v23  ;;  %2793 = vpow2.f32 %v1477_v54 }
 0x5b2   :  { %v4147_v43 = vadd.f32 %v4102_v30, %v1493_v41  ;;  %v1518_v19 = vadd.f32 %v1517_v9, %v1516_v6  ;;  %v1508_v57 = vrot.slane %v1507_v36, 2  ;;  %1760 = vperm.xlu0 %2637, %v4143_v10   ;;  %v1468_v9 = vsub.f32 %v4076_v23, %v1380_v15 }
 0x5b3   :  { %v4150_v61 = vpop.eup %2785  ;;  %1597 = vperm.xlu1 %2638, %v2774_v62   ;;  %v1427_v34 = vsub.f32 %v4072_v32, %v1412_v21  ;;  %v1428_v47 = vsub.f32 %v4079_v5, %v1412_v21  ;;  %v1408_v13 = vrot.slane %v4154_v45, %v4044_v58 }
 0x5b4   :  { %v1519_v3 = vrot.slane %v1518_v19, 1  ;;  %v1509_v28 = vadd.f32 %v1508_v57, %v1507_v36  ;;  %v1530_v37 = vsel %vm1300_vm1, %v4150_v61, 0.0  ;;  %v1483_v54 = vmul.f32 1.442695, %v1468_v9 }
 0x5b5   :  { %v2788_v30 = vpop.eup %2787  ;;  %v1457_v46 = vmul.f32 1.442695, %v1427_v34  ;;  %v1459_v63 = vmul.f32 1.442695, %v1428_v47  ;;  %v1425_v6 = vsub.f32 %v4074_v17, %v1408_v13  ;;  %v1426_v56 = vsub.f32 %v4082_v50, %v1408_v13 }
 0x5b6   :  { %v1520_v20 = vadd.f32 %v1519_v3, %v1518_v19  ;;  %v1510_v26 = vrot.slane %v1509_v28, 1  ;;  %v1531_v44 = vsel %vm1300_vm1, %v2788_v30, 0.0  ;;  %1622 = vperm.xlu0 %2637, %v2788_v30  }
 0x5b7   :  { %v2790_v4 = vpop.eup %2789  ;;  %v1532_v62 = vadd.f32 %v1531_v44, %v1530_v37  ;;  %1602 = vperm.xlu1 %2638, %v4123_v31   ;;  %2795 = vpow2.f32 %v1457_v46  ;;  %v1453_v36 = vmul.f32 1.442695, %v1425_v6  ;;  %v1455_v52 = vmul.f32 1.442695, %v1426_v56 }
 0x5b8   :  { %v4164_v1 = vadd.f32 %v2782_v40, %v1520_v20  ;;  %v1511_v32 = vadd.f32 %v1510_v26, %v1509_v28  ;;  %v1521_v5 = vsel %vm1300_vm1, %v2790_v4, 0.0  ;;  %2797 = vpow2.f32 %v1459_v63 }
 0x5b9   :  { %v2792_v49 = vpop.eup %2791  ;;  %v1533_v55 = vrot.slane %v1532_v62, 4  ;;  %2799 = vpow2.f32 %v1453_v36 }
 0x5ba   :  { %v1559_v33 = vadd.f32 %v4118_v38, %v1511_v32  ;;  %v1522_v41 = vsel %vm1300_vm1, %v2792_v49, 0.0  ;;  %1612 = vperm.xlu0 %2637, %v2792_v49   ;;  %2801 = vpow2.f32 %v1455_v52 }
 0x5bb   :  { %v1534_v31 = vadd.f32 %v1533_v55, %v1532_v62  ;;  %v1523_v40 = vadd.f32 %v1522_v41, %v1521_v5  ;;  %1587 = vperm.xlu1 %2638, %v4127_v14   ;;  %v2794_v38 = vpop.eup %2793  ;;  %2803 = vpow2.f32 %v1483_v54  ;;  %v1467_v14 = vsub.f32 %v4076_v23, %v4154_v45 }
 0x5bc   :  { %2805 = vrcp.f32 %v4141_v18 }
 0x5bd   :  { %v1535_v17 = vrot.slane %v1534_v31, 2  ;;  %v1524_v19 = vrot.slane %v1523_v40, 4  ;;  %v1481_v46 = vmul.f32 1.442695, %v1467_v14  ;;  %2807 = vrcp.f32 %v1559_v33 }
 0x5be   :  { %v4192_v14 = vsub.s32 1, %v3669_v53 }
 0x5bf   :  { %v1536_v57 = vadd.f32 %v1535_v17, %v1534_v31  ;;  %v1525_v50 = vadd.f32 %v1524_v19, %v1523_v40  ;;  %1592 = vperm.xlu1 %2638, %v4132_v27   ;;  %2809 = vpow2.f32 %v1481_v46 }
 0x5c1   :  { %v1537_v21 = vrot.slane %v1536_v57, 1  ;;  %v1526_v15 = vrot.slane %v1525_v50, 2  ;;  %v2796_v3 = vpop.eup %2795 }
 0x5c2   :  { %v1548_v30 = vsel %vm1300_vm1, %v2796_v3, 0.0  ;;  %v2798_v34 = vpop.eup %2797 }
 0x5c3   :  { %v1538_v28 = vadd.f32 %v1537_v21, %v1536_v57  ;;  %v1527_v37 = vadd.f32 %v1526_v15, %v1525_v50  ;;  %1755 = vperm.xlu1 %2638, %v2794_v38   ;;  %v1549_v20 = vsel %vm1300_vm1, %v2798_v34, 0.0  ;;  %1642 = vperm.xlu0 %2637, %v2798_v34   ;;  %v2800_v27 = vpop.eup %2799  ;;  %v4194_v34 = vld [vmem:[#allocation10 + $0x8] sm:$0xff] }
 0x5c4   :  { %v1550_v44 = vadd.f32 %v1549_v20, %v1548_v30  ;;  %v2802_v62 = vpop.eup %2801  ;;  %v1539_v63 = vsel %vm1300_vm1, %v2800_v27, 0.0  ;;  %v2662_v30 = vld [vmem:[#allocation14 + $0x18] sm:$0xff]  }
 0x5c5   :  { %v1562_v47 = vadd.f32 %v4143_v10, %v1538_v28  ;;  %v1528_v13 = vrot.slane %v1527_v37, 1  ;;  %v1540_v5 = vsel %vm1300_vm1, %v2802_v62, 0.0  ;;  %v2804_v18 = vpop.eup %2803  ;;  %v2660_v28 = vld [vmem:[#allocation14 + $0x8] sm:$0xff]  }
 0x5c6   :  { %v1551_v45 = vrot.slane %v1550_v44, 4  ;;  %v1541_v10 = vadd.f32 %v1540_v5, %v1539_v63  ;;  %v2806_v9 = vpop.eup %2805 }
 0x5c7   :  { %v1529_v26 = vadd.f32 %v1528_v13, %v1527_v37  ;;  %1617 = vperm.xlu1 %2638, %v4150_v61   ;;  %1632 = vperm.xlu0 %2637, %v2802_v62   ;;  %2811 = vrcp.f32 %v1562_v47  ;;  %v2808_v33 = vpop.eup %2807  ;;  %v2661_v37 = vld [vmem:[#allocation14 + $0x10] sm:$0xff]   ;;  %v4200_v13 = vrot.slane %v4194_v34, %v4192_v14 }
 0x5c8   :  { %v1552_v6 = vadd.f32 %v1551_v45, %v1550_v44  ;;  %v1542_v49 = vrot.slane %v1541_v10, 4  ;;  %2813 = vrcp.f32 %v4147_v43 }
 0x5c9   :  { %v1561_v32 = vadd.f32 %v2794_v38, %v1529_v26  ;;  %2815 = vrcp.f32 %v4164_v1  ;;  %v2810_v17 = vpop.eup %2809  ;;  %v2659_v38 = vld [vmem:[#allocation14] sm:$0xff]   ;;  %v3179_v1 = vmov 0.0   ;;  %v1117_v26 = vadd.f32 %v3979_v24, %v4200_v13 }
 0x5ca   :  { %v1553_v55 = vrot.slane %v1552_v6, 2  ;;  %v1543_v56 = vadd.f32 %v1542_v49, %v1541_v10  ;;  %2590 = vmatprep.subr.bf16.mxu1 %v3179_v1  ;;  %2598 = vmatprep.mubr.msk.bf16.mxu1 %vm3180_vm2, %v3179_v1  ;;  %v1120_v44 = vadd.f32 %v3983_v8, %v4200_v13  ;;  %v1112_v5 = vadd.f32 %v3985_v35, %v4200_v13 }
 0x5cb   :  { %1607 = vperm.xlu1 %2638, %v2790_v4   ;;  %1770 = vperm.xlu0 %2637, %v2804_v18   ;;  %v1133_v35 = vadd.f32 %v3987_v11, %v4200_v13 }
 0x5cc   :  { %v1554_v61 = vadd.f32 %v1553_v55, %v1552_v6  ;;  %v1544_v41 = vrot.slane %v1543_v56, 2  ;;  %2591 = vmatpush3.bf16.msra.mxu1 %v2659_v38  ;;  %v1128_v38 = vadd.f32 %v3993_v22, %v4200_v13  ;;  %v1149_v22 = vadd.f32 %v3995_v42, %v4200_v13 }
 0x5cd   :  { %2592 = vmatprep.subr.bf16.mxu1 %v3179_v1 }
 0x5ce   :  { %v1555_v36 = vrot.slane %v1554_v61, 1  ;;  %v1545_v31 = vadd.f32 %v1544_v41, %v1543_v56 }
 0x5cf   :  { %1637 = vperm.xlu1 %2638, %v2796_v3   ;;  %1808 = vperm.xlu0 %2637, %v2806_v9  }
 0x5d0   :  { %v1556_v40 = vadd.f32 %v1555_v36, %v1554_v61  ;;  %v1546_v4 = vrot.slane %v1545_v31, 1  ;;  %2593 = vmatpush3.bf16.msra.mxu1 %v2660_v28 }
 0x5d1   :  { %v2812_v43 = vpop.eup %2811  ;;  %2594 = vmatprep.subr.bf16.mxu1 %v3179_v1 }
 0x5d2   :  { %v1564_v52 = vadd.f32 %v2804_v18, %v1556_v40  ;;  %v1547_v19 = vadd.f32 %v1546_v4, %v1545_v31  ;;  %v2814_v50 = vpop.eup %2813  ;;  %v1136_v31 = vadd.f32 %v3991_v7, %v4200_v13 }
 0x5d3   :  { %1627 = vperm.xlu1 %2638, %v2800_v27   ;;  %1813 = vperm.xlu0 %2637, %v2808_v33   ;;  %v2816_v54 = vpop.eup %2815 }
 0x5d4   :  { %2817 = vrcp.f32 %v1564_v52  ;;  %v1563_v57 = vadd.f32 %v2810_v17, %v1547_v19  ;;  %2595 = vmatpush3.bf16.msra.mxu1 %v2661_v37 }
 0x5d5   :  { %2819 = vrcp.f32 %v1561_v32  ;;  %2596 = vmatprep.subr.bf16.mxu1 %v3179_v1  ;;  %v1109_v32 = vadd.f32 %v3981_v60, %v4200_v13 }
 0x5d6   :  { %2821 = vrcp.f32 %v1563_v57 }
 0x5d7   :  { %1765 = vperm.xlu1 %2638, %v2810_v17   ;;  %1828 = vperm.xlu0 %2637, %v2812_v43  }
 0x5d8   :  { %2597 = vmatpush3.bf16.msra.mxu1 %v2662_v30 }
 0x5db   :  { %1803 = vperm.xlu1 %2638, %v2814_v50  }
 0x5de   :  { %v2818_v21 = vpop.eup %2817 }
 0x5df   :  { %1818 = vperm.xlu1 %2638, %v2816_v54   ;;  %v2820_v15 = vpop.eup %2819  ;;  %1838 = vperm.xlu0 %2637, %v2818_v21   ;;  %v1125_v54 = vadd.f32 %v3989_v16, %v4200_v13  ;;  %v1152_v16 = vadd.f32 %v3999_v25, %v4200_v13 }
 0x5e0   :  { %v2822_v3 = vpop.eup %2821 }
 0x5e3   :  { %1823 = vperm.xlu1 %2638, %v2820_v15  }
 0x5e7   :  { %1833 = vperm.xlu1 %2638, %v2822_v3  }
 0x61d   :  { %v4202_v20 = vpop.permute.xlu0 %1740 }
 0x61e   :  { %v4196_v47 = vpop.permute.xlu1 %1735 }
 0x621   :  { %v1568_v46 = vpop.permute.xlu0 %1567 }
 0x622   :  { %v1578_v27 = vpop.permute.xlu1 %1577  ;;  %v1645_v10 = vmul.f32 %v1568_v46, %v1109_v32 }
 0x623   :  { %v1647_v62 = vmul.f32 %v1578_v27, %v1117_v26 }
 0x624   :  { %v1661_v8 = vsel %vm369_vm0, %v1645_v10, 0.0 }
 0x625   :  { %v1670_v6 = vsel %vm369_vm0, %v1647_v62, 0.0 }
 0x626   :  { %v1583_v63 = vpop.permute.xlu1 %1582  ;;  %v4218_v60 = vpop.permute.xlu0 %1745 }
 0x627   :  { %v1648_v45 = vmul.f32 %v1583_v63, %v1120_v44 }
 0x629   :  { %v1671_v49 = vsel %vm369_vm0, %v1648_v45, 0.0 }
 0x62a   :  { %v1672_v18 = vadd.f32 %v1671_v49, %v1670_v6  ;;  %v1573_v24 = vpop.permute.xlu1 %1572  ;;  %v1144_v49 = vadd.f32 %v4001_v12, %v4200_v13 }
 0x62b   :  { %v1646_v55 = vmul.f32 %v1573_v24, %v1112_v5  ;;  %v1141_v24 = vadd.f32 %v3997_v2, %v4200_v13  ;;  %v1168_v2 = vadd.f32 %v4007_v59, %v4200_v13 }
 0x62c   :  { %v1673_v52 = vrot.slane %v1672_v18, 4 }
 0x62d   :  { %v1662_v56 = vsel %vm369_vm0, %v1646_v55, 0.0 }
 0x62e   :  { %v1663_v61 = vadd.f32 %v1662_v56, %v1661_v8  ;;  %v4216_v41 = vpop.permute.xlu1 %1750  ;;  %v1674_v11 = vadd.f32 %v1673_v52, %v1672_v18  ;;  %v1165_v52 = vadd.f32 %v4003_v39, %v4200_v13  ;;  %v1157_v39 = vadd.f32 %v4005_v48, %v4200_v13 }
 0x630   :  { %v1675_v28 = vrot.slane %v1674_v11, 2  ;;  %v1664_v37 = vrot.slane %v1663_v61, 4 }
 0x631   :  { %v4222_v36 = vpop.permute.xlu0 %1760 }
 0x632   :  { %v1598_v9 = vpop.permute.xlu1 %1597  ;;  %v1665_v62 = vadd.f32 %v1664_v37, %v1663_v61  ;;  %v1676_v63 = vadd.f32 %v1675_v28, %v1674_v11  ;;  %v1160_v28 = vadd.f32 %v4009_v51, %v4200_v13 }
 0x633   :  { %v1651_v40 = vmul.f32 %v1598_v9, %v1133_v35 }
 0x634   :  { %v1666_v55 = vrot.slane %v1665_v62, 2  ;;  %v1677_v8 = vrot.slane %v1676_v63, 1 }
 0x635   :  { %v1623_v17 = vpop.permute.xlu0 %1622  ;;  %v1688_v19 = vsel %vm369_vm0, %v1651_v40, 0.0 }
 0x636   :  { %v1603_v4 = vpop.permute.xlu1 %1602  ;;  %v1656_v32 = vmul.f32 %v1623_v17, %v1152_v16  ;;  %v1678_v17 = vadd.f32 %v1677_v8, %v1676_v63 }
 0x637   :  { %v1652_v33 = vmul.f32 %v1603_v4, %v1136_v31  ;;  %v4248_v31 = vrot.slane %v4076_v23, %v4192_v14 }
 0x638   :  { %v1707_v56 = vsel %vm369_vm0, %v1656_v32, 0.0 }
 0x639   :  { %v1689_v57 = vsel %vm369_vm0, %v1652_v33, 0.0  ;;  %v1613_v15 = vpop.permute.xlu0 %1612  ;;  %v1779_v51 = vmul.f32 %v4248_v31, %v4218_v60 }
 0x63a   :  { %v1690_v43 = vadd.f32 %v1689_v57, %v1688_v19  ;;  %v1588_v50 = vpop.permute.xlu1 %1587  ;;  %v1654_v61 = vmul.f32 %v1613_v15, %v1144_v49  ;;  %v1667_v57 = vadd.f32 %v1666_v55, %v1665_v62 }
 0x63b   :  { %v1649_v21 = vmul.f32 %v1588_v50, %v1125_v54 }
 0x63c   :  { %v1691_v45 = vrot.slane %v1690_v43, 4  ;;  %v1668_v16 = vrot.slane %v1667_v57, 1 }
 0x63d   :  { %v1679_v30 = vsel %vm369_vm0, %v1649_v21, 0.0  ;;  %v1778_v21 = vmul.f32 %v4248_v31, %v4202_v20 }
 0x63e   :  { %v1593_v7 = vpop.permute.xlu1 %1592  ;;  %v1692_v9 = vadd.f32 %v1691_v45, %v1690_v43  ;;  %v1698_v43 = vsel %vm369_vm0, %v1654_v61, 0.0 }
 0x63f   :  { %v1650_v3 = vmul.f32 %v1593_v7, %v1128_v38 }
 0x640   :  { %v1693_v50 = vrot.slane %v1692_v9, 2 }
 0x641   :  { %v1680_v27 = vsel %vm369_vm0, %v1650_v3, 0.0 }
 0x642   :  { %v1681_v26 = vadd.f32 %v1680_v27, %v1679_v30  ;;  %v4234_v44 = vpop.permute.xlu1 %1755  ;;  %v1643_v5 = vpop.permute.xlu0 %1642  ;;  %v1786_v30 = vadd.f32 %v1778_v21, %v1678_v17 }
 0x643   :  { %v1660_v54 = vmul.f32 %v1643_v5, %v1168_v2  ;;  %v1782_v2 = vmul.f32 %v4248_v31, %v4222_v36 }
 0x644   :  { %v1682_v46 = vrot.slane %v1681_v26, 4 }
 0x645   :  { %v1725_v62 = vsel %vm369_vm0, %v1660_v54, 0.0 }
 0x646   :  { %v1683_v10 = vadd.f32 %v1682_v46, %v1681_v26  ;;  %v1618_v6 = vpop.permute.xlu1 %1617  ;;  %v1633_v42 = vpop.permute.xlu0 %1632 }
 0x647   :  { %v1655_v18 = vmul.f32 %v1618_v6, %v1149_v22  ;;  %v1658_v46 = vmul.f32 %v1633_v42, %v1160_v28  ;;  %v1694_v22 = vadd.f32 %v1693_v50, %v1692_v9 }
 0x648   :  { %v1684_v25 = vrot.slane %v1683_v10, 2 }
 0x649   :  { %v1706_v35 = vsel %vm369_vm0, %v1655_v18, 0.0  ;;  %v1695_v8 = vrot.slane %v1694_v22, 1 }
 0x64a   :  { %v1708_v40 = vadd.f32 %v1707_v56, %v1706_v35  ;;  %v1685_v12 = vadd.f32 %v1684_v25, %v1683_v10  ;;  %v1608_v4 = vpop.permute.xlu1 %1607  ;;  %v4255_v11 = vpop.permute.xlu0 %1770  ;;  %v1669_v25 = vadd.f32 %v1668_v16, %v1667_v57  ;;  %v1716_v56 = vsel %vm369_vm0, %v1658_v46, 0.0 }
 0x64b   :  { %v1653_v33 = vmul.f32 %v1608_v4, %v1141_v24  ;;  %v1696_v57 = vadd.f32 %v1695_v8, %v1694_v22 }
 0x64c   :  { %v1709_v19 = vrot.slane %v1708_v40, 4  ;;  %v1686_v59 = vrot.slane %v1685_v12, 1 }
 0x64d   :  { %v1697_v38 = vsel %vm369_vm0, %v1653_v33, 0.0 }
 0x64e   :  { %v1710_v7 = vadd.f32 %v1709_v19, %v1708_v40  ;;  %v1699_v15 = vadd.f32 %v1698_v43, %v1697_v38  ;;  %v1638_v3 = vpop.permute.xlu1 %1637  ;;  %v1809_v63 = vpop.permute.xlu0 %1808  ;;  %v1687_v32 = vadd.f32 %v1686_v59, %v1685_v12  ;;  %v1777_v40 = vmul.f32 %v4248_v31, %v4196_v47 }
 0x64f   :  { %v1659_v37 = vmul.f32 %v1638_v3, %v1165_v52  ;;  %v1842_v6 = vmul.f32 %v1809_v63, %v1786_v30  ;;  %v1781_v63 = vmul.f32 %v4248_v31, %v4234_v44 }
 0x650   :  { %v1711_v27 = vrot.slane %v1710_v7, 2  ;;  %v1700_v26 = vrot.slane %v1699_v15, 4  ;;  %v1787_v61 = vadd.f32 %v1779_v51, %v1687_v32  ;;  %v1785_v19 = vadd.f32 %v1777_v40, %v1669_v25 }
 0x651   :  { %v1724_v20 = vsel %vm369_vm0, %v1659_v37, 0.0  ;;  %v1858_v33 = vpack.c.bf16 %v1842_v6, %v1842_v6 }
 0x652   :  { %v1701_v45 = vadd.f32 %v1700_v26, %v1699_v15  ;;  %v1712_v5 = vadd.f32 %v1711_v27, %v1710_v7  ;;  %v1726_v10 = vadd.f32 %v1725_v62, %v1724_v20  ;;  %v1628_v48 = vpop.permute.xlu1 %1627  ;;  %v1814_v12 = vpop.permute.xlu0 %1813  ;;  %v1780_v7 = vmul.f32 %v4248_v31, %v4216_v41 }
 0x653   :  { %v1657_v13 = vmul.f32 %v1628_v48, %v1157_v39  ;;  %v1843_v50 = vmul.f32 %v1814_v12, %v1787_v61  ;;  %v1878_v15 = vunpack.c.l.b16 %v1858_v33  ;;  %v1784_v27 = vmul.f32 %v4248_v31, %v4255_v11 }
 0x654   :  { %v1702_v49 = vrot.slane %v1701_v45, 2  ;;  %v1713_v18 = vrot.slane %v1712_v5, 1  ;;  %v1727_v24 = vrot.slane %v1726_v10, 4  ;;  %v1788_v37 = vadd.f32 %v1780_v7, %v1696_v57 }
 0x655   :  { %v1715_v55 = vsel %vm369_vm0, %v1657_v13, 0.0  ;;  %v1859_v26 = vpack.c.bf16 %v1843_v50, %v1843_v50  ;;  %v1886_v32 = vrot.slane %v1878_v15, 1 }
 0x656   :  { %v1714_v9 = vadd.f32 %v1713_v18, %v1712_v5  ;;  %v1728_v42 = vadd.f32 %v1727_v24, %v1726_v10  ;;  %v1766_v35 = vpop.permute.xlu1 %1765  ;;  %v1717_v60 = vadd.f32 %v1716_v56, %v1715_v55  ;;  %v1703_v4 = vadd.f32 %v1702_v49, %v1701_v45  ;;  %v1829_v39 = vpop.permute.xlu0 %1828 }
 0x657   :  { %v1879_v11 = vunpack.c.l.b16 %v1859_v26  ;;  %v1783_v18 = vmul.f32 %v4248_v31, %v1766_v35 }
 0x658   :  { %v1729_v52 = vrot.slane %v1728_v42, 2  ;;  %v1718_v17 = vrot.slane %v1717_v60, 4  ;;  %v1704_v43 = vrot.slane %v1703_v4, 1  ;;  %v1790_v54 = vadd.f32 %v1782_v2, %v1714_v9 }
 0x65a   :  { %v1730_v38 = vadd.f32 %v1729_v52, %v1728_v42  ;;  %v1804_v21 = vpop.permute.xlu1 %1803  ;;  %v1719_v47 = vadd.f32 %v1718_v17, %v1717_v60  ;;  %v1705_v30 = vadd.f32 %v1704_v43, %v1703_v4  ;;  %v1846_v16 = vmul.f32 %v1829_v39, %v1790_v54 }
 0x65b   :  { %v1841_v59 = vmul.f32 %v1804_v21, %v1785_v19 }
 0x65c   :  { %v1731_v3 = vrot.slane %v1730_v38, 1  ;;  %v1720_v28 = vrot.slane %v1719_v47, 2  ;;  %v1789_v51 = vadd.f32 %v1781_v63, %v1705_v30  ;;  %v1862_v6 = vpack.c.bf16 %v1846_v16, %v1846_v16  ;;  %v2668_v63 = vld [vmem:[#allocation16 + $0x14] ss:$8 sps:$4 sm:$0xff]  }
 0x65d   :  { %v1857_v36 = vpack.c.bf16 %v1841_v59, %v1841_v59  ;;  %v1868_v59 = vrot.slane %v4194_v34, %v4044_v58 }
 0x65e   :  { %v1732_v62 = vadd.f32 %v1731_v3, %v1730_v38  ;;  %v1819_v46 = vpop.permute.xlu1 %1818  ;;  %v1721_v22 = vadd.f32 %v1720_v28, %v1719_v47  ;;  %v1839_v5 = vpop.permute.xlu0 %1838  ;;  %v1882_v40 = vunpack.c.l.b16 %v1862_v6  ;;  %v4284_v47 = vsub.s32 0, %v3669_v53  ;;  %v2681_v6 = vld [vmem:[#allocation19 + $0x58] sm:$0xff]  }
 0x65f   :  { %v1877_v41 = vunpack.c.l.b16 %v1857_v36  ;;  %v1844_v20 = vmul.f32 %v1819_v46, %v1788_v37  ;;  %v2665_v46 = vld [vmem:[#allocation16 + $0x4] ss:$8 sps:$4 sm:$0xff]  }
 0x660   :  { %v1792_v45 = vadd.f32 %v1784_v27, %v1732_v62  ;;  %v1722_v13 = vrot.slane %v1721_v22, 1  ;;  %v1897_v35 = vrot.slane %v1882_v40, 5  ;;  %v1977_v15 = vrot.slane %v4076_v23, %v4284_v47  ;;  %v2663_v23 = vld [vmem:[#allocation16] ss:$8 sps:$4 sm:$0xff]   ;;  %2066 = vmatprep.subr.bf16.mxu1 %v2665_v46 }
 0x661   :  { %v1885_v10 = vrot.slane %v1877_v41, 2  ;;  %v1860_v48 = vpack.c.bf16 %v1844_v20, %v1844_v20  ;;  %v2666_v41 = vld [vmem:[#allocation16 + $0x10] ss:$8 sps:$4 sm:$0xff]   ;;  %v2671_v20 = vld [vmem:[#allocation16 + $0x24] ss:$8 sps:$4 sm:$0xff]  }
 0x662   :  { %v1848_v49 = vmul.f32 %v1839_v5, %v1792_v45  ;;  %v1824_v24 = vpop.permute.xlu1 %1823  ;;  %v1723_v8 = vadd.f32 %v1722_v13, %v1721_v22  ;;  %v2675_v22 = vld [vmem:[#allocation19 + $0x40] sm:$0xff]   ;;  %v2677_v45 = vld [vmem:[#allocation19 + $0x48] sm:$0xff]  }
 0x663   :  { %v1888_v55 = vsel %vm1887_vm3, %v1886_v32, %v1885_v10  ;;  %v1880_v44 = vunpack.c.l.b16 %v1860_v48  ;;  %v1845_v25 = vmul.f32 %v1824_v24, %v1789_v51  ;;  %v2676_v32 = vld [vmem:[#allocation19] sm:$0xff]   ;;  %v2674_v10 = vld [vmem:[#allocation16 + $0x34] ss:$8 sps:$4 sm:$0xff]   ;;  %2515 = vmatprep.subr.bf16.mxu0 %v2675_v22  ;;  %v2678_v48 = vld [vmem:[#allocation19 + $0x8] sm:$0xff]   ;;  %v2160_v22 = vrot.slane %v4194_v34, %v720_v29 }
 0x664   :  { %v1890_v56 = vsel %vm1889_vm4, %v1879_v11, %v1888_v55  ;;  %v1791_v42 = vadd.f32 %v1783_v18, %v1723_v8  ;;  %v1864_v12 = vpack.c.bf16 %v1848_v49, %v1848_v49  ;;  %v2669_v5 = vld [vmem:[#allocation16 + $0x20] ss:$8 sps:$4 sm:$0xff]   ;;  %2516 = vmatpush3.bf16.msra.mxu0 %v2676_v32  ;;  %v2679_v51 = vld [vmem:[#allocation19 + $0x50] sm:$0xff]  }
 0x665   :  { %v1891_v61 = vrot.slane %v1880_v44, 7  ;;  %v1861_v9 = vpack.c.bf16 %v1845_v25, %v1845_v25  ;;  %2517 = vmatprep.subr.bf16.mxu0 %v2677_v45  ;;  %v2672_v13 = vld [vmem:[#allocation16 + $0x30] ss:$8 sps:$4 sm:$0xff]   ;;  %v1994_v44 = vsub.s32 7, %v3669_v53 }
 0x666   :  { %v1834_v60 = vpop.permute.xlu1 %1833  ;;  %v1884_v17 = vunpack.c.l.b16 %v1864_v12  ;;  %v2680_v11 = vld [vmem:[#allocation19 + $0x10] sm:$0xff]   ;;  %v2682_v49 = vld [vmem:[#allocation19 + $0x18] sm:$0xff]  }
 0x667   :  { %v1893_v4 = vsel %vm1892_vm5, %v1891_v61, %v1890_v56  ;;  %v1881_v2 = vunpack.c.l.b16 %v1861_v9  ;;  %v1847_v33 = vmul.f32 %v1834_v60, %v1791_v42  ;;  %v2834_v25 = vld [vmem:[#allocation10] sm:$0xff]  ;;  %v2000_v61 = vrot.slane %v4194_v34, %v4284_v47  ;;  %v2683_v60 = vld [vmem:[#allocation19 + $0x60] sm:$0xff]  }
 0x668   :  { %v1903_v54 = vrot.slane %v1884_v17, 3  ;;  %2518 = vmatpush3.bf16.msra.mxu0 %v2678_v48  ;;  %v1995_v8 = vrot.slane %v2834_v25, %v1994_v44  ;;  %v2688_v17 = vld [vmem:[#allocation19 + $0x30] sm:$0xff]  }
 0x669   :  { %v1894_v52 = vrot.slane %v1881_v2, 6  ;;  %v1863_v31 = vpack.c.bf16 %v1847_v33, %v1847_v33  ;;  %2519 = vmatprep.subr.bf16.mxu0 %v2679_v51  ;;  %v2685_v2 = vld [vmem:[#allocation19 + $0x68] sm:$0xff]  }
 0x66a   :  { %v2686_v33 = vld [vmem:[#allocation19 + $0x28] sm:$0xff]  }
 0x66b   :  { %v1896_v19 = vsel %vm1895_vm6, %v1894_v52, %v1893_v4  ;;  %v1883_v57 = vunpack.c.l.b16 %v1863_v31  ;;  %v2684_v4 = vld [vmem:[#allocation19 + $0x20] sm:$0xff]   ;;  %v2687_v31 = vld [vmem:[#allocation19 + $0x70] sm:$0xff]  }
 0x66c   :  { %v1899_v43 = vsel %vm1898_vm7, %v1897_v35, %v1896_v19  ;;  %2520 = vmatpush3.bf16.msra.mxu0 %v2680_v11  ;;  %v2691_v52 = vld [vmem:[#allocation20] sm:$0xff]   ;;  %v2692_v35 = vld [vmem:[#allocation20 + $0x8] sm:$0xff]   ;;  %v2689_v19 = vld [vmem:[#allocation19 + $0x78] sm:$0xff]  }
 0x66d   :  { %v1900_v50 = vrot.slane %v1883_v57, 4  ;;  %2521 = vmatprep.subr.bf16.mxu0 %v2681_v6  ;;  %v2690_v57 = vld [vmem:[#allocation19 + $0x38] sm:$0xff]   ;;  %v2480_v11 = vld [vmem:[#allocation22] ss:$0 sm:$0xff] }
 0x66f   :  { %v1902_v38 = vsel %vm1901_vm8, %v1900_v50, %v1899_v43  ;;  %v2011_v43 = vld [vmem:[#allocation17] sm:$0x3] }
 0x670   :  { %v1905_v21 = vsel %vm1904_vm9, %v1903_v54, %v1902_v38  ;;  %2522 = vmatpush3.bf16.msra.mxu0 %v2682_v49  ;;  %v2016_v50 = vrot.slane %v2011_v43, %v4284_v47  ;;  %v2020_v54 = vrot.slane %v2011_v43, %v4192_v14 }
 0x671   :  { %v1906_v7 = vpack.c.b16 %v1905_v21, %v1905_v21  ;;  %2523 = vmatprep.subr.bf16.mxu0 %v2683_v60 }
 0x673   :  { %2599 = vmatmul.mubr.msk.bf16.vlgmr.msra.gmra.mrb[32].mxu1 %vm369_vm0, %v1906_v7 }
 0x674   :  { %2098 = vmatprep.mubr.bf16.mxu1 %v3178_v0  ;;  %2067 = vmatpush1.bf16.msra.mxu1 %v2663_v23 }
 0x675   :  { %2068 = vmatprep.subr.bf16.mxu1 %v2668_v63  ;;  %2524 = vmatpush3.bf16.msra.mxu0 %v2684_v4  ;;  %v2693_v63 = vld [vmem:[#allocation20 + $0x10] sm:$0xff]  }
 0x676   :  { %2525 = vmatprep.subr.bf16.mxu0 %v2685_v2 }
 0x678   :  { %2069 = vmatpush1.bf16.msra.mxu1 %v2666_v41  ;;  %v2694_v41 = vld [vmem:[#allocation20 + $0x18] sm:$0xff]  }
 0x679   :  { %2070 = vmatprep.subr.bf16.mxu1 %v2671_v20  ;;  %2526 = vmatpush3.bf16.msra.mxu0 %v2686_v33 }
 0x67a   :  { %2527 = vmatprep.subr.bf16.mxu0 %v2687_v31 }
 0x67c   :  { %2071 = vmatpush1.bf16.msra.mxu1 %v2669_v5 }
 0x67d   :  { %2072 = vmatprep.subr.bf16.mxu1 %v2674_v10  ;;  %2528 = vmatpush3.bf16.msra.mxu0 %v2688_v17 }
 0x67e   :  { %2529 = vmatprep.subr.bf16.mxu0 %v2689_v19 }
 0x680   :  { %2073 = vmatpush1.bf16.msra.mxu1 %v2672_v13 }
 0x681   :  { %2602 = vmatprep.subr.bf16.mxu1 %v3179_v1  ;;  %2530 = vmatpush3.bf16.msra.mxu0 %v2690_v57 }
 0x746   :  { %v1968_v3 = vpop.f32.mrb[32].mxu1 }
 0x747   :  { %v1969_v39 = vadd.f32 %v1968_v3, %v1868_v59  ;;  %v2600_v28 = vpop.f32.mrb[33].mxu1 }
 0x748   :  { %v1971_v36 = vpop.f32.mrb[34].mxu1 }
 0x749   :  { %v4290_v37 = vadd.f32 %v1977_v15, %v1969_v39  ;;  %v2601_v30 = vpop.f32.mrb[35].mxu1 }
 0x74b   :  { %v1979_v27 = vsel %vm369_vm0, %v4290_v37, 0.0 }
 0x74c   :  { %1980 = vadd.xlane.f32.xlu1 %v1979_v27 }
 0x7d9   :  { %v1981_v0 = vpop.xlane.xlu1 %1980 }
 0x7da   :  { %v1982_v26 = vmul.f32 0.015625, %v1981_v0 }
 0x7dc   :  { %v1983_v16 = vsub.f32 %v4290_v37, %v1982_v26 }
 0x7de   :  { %v1984_v62 = vmul.f32 %v1983_v16, %v1983_v16 }
 0x7e0   :  { %v1985_v58 = vsel %vm369_vm0, %v1984_v62, 0.0 }
 0x7e1   :  { %1986 = vadd.xlane.f32.xlu0 %v1985_v58 }
 0x86e   :  { %v1987_v18 = vpop.xlane.xlu0 %1986 }
 0x86f   :  { %v1988_v24 = vmul.f32 0.015625, %v1987_v18 }
 0x871   :  { %v1989_v55 = vadd.f32 1e-05, %v1988_v24 }
 0x873   :  { %2823 = vrsqrt.f32 %v1989_v55 }
 0x87d   :  { %v2824_v56 = vpop.eup %2823 }
 0x87e   :  { %v1991_v9 = vmul.f32 %v2824_v56, %v1983_v16 }
 0x880   :  { %v1996_v42 = vmul.f32 %v1995_v8, %v1991_v9 }
 0x882   :  { %v2001_v40 = vadd.f32 %v2000_v61, %v1996_v42 }
 0x884   :  { %v2010_v12 = vpack.c.bf16 %v2001_v40, %v2001_v40 }
 0x886   :  { %2461 = vmatmul.mubr.msk.bf16.vlgmr.msra.gmra.mrb[36].mxu1 %vm369_vm0, %v2010_v12 }
 0x887   :  { %2610 = vmatprep.mubr.msk.bf16.mxu1 %vm3180_vm2, %v3179_v1  ;;  %2603 = vmatpush3.bf16.msra.mxu1 %v2691_v52 }
 0x888   :  { %2604 = vmatprep.subr.bf16.mxu1 %v3179_v1 }
 0x88b   :  { %2605 = vmatpush3.bf16.msra.mxu1 %v2692_v35 }
 0x88c   :  { %2606 = vmatprep.subr.bf16.mxu1 %v3179_v1 }
 0x88f   :  { %2607 = vmatpush3.bf16.msra.mxu1 %v2693_v63 }
 0x890   :  { %2608 = vmatprep.subr.bf16.mxu1 %v3179_v1 }
 0x893   :  { %2609 = vmatpush3.bf16.msra.mxu1 %v2694_v41 }
 0x959   :  { %v2100_v38 = vpop.f32.mrb[36].mxu1 }
 0x95a   :  { %v2101_v21 = vadd.f32 %v2100_v38, %v2016_v50  ;;  %v2102_v7 = vpop.f32.mrb[37].mxu1 }
 0x95b   :  { %v2103_v59 = vadd.f32 %v2102_v7, %v2020_v54  ;;  %v2104_v15 = vpop.f32.mrb[38].mxu1 }
 0x95c   :  { %v2462_v3 = vmul.f32 -1.702, %v2101_v21  ;;  %v2105_v39 = vpop.f32.mrb[39].mxu1 }
 0x95d   :  { %v2463_v28 = vmul.f32 -1.702, %v2103_v59 }
 0x95e   :  { %v2111_v36 = vmul.f32 1.442695, %v2462_v3 }
 0x95f   :  { %v2113_v30 = vmul.f32 1.442695, %v2463_v28 }
 0x960   :  { %2825 = vpow2.f32 %v2111_v36 }
 0x961   :  { %2827 = vpow2.f32 %v2113_v30 }
 0x96a   :  { %v2826_v27 = vpop.eup %2825 }
 0x96b   :  { %v2828_v0 = vpop.eup %2827  ;;  %v2115_v26 = vadd.f32 1.0, %v2826_v27 }
 0x96c   :  { %v2116_v16 = vadd.f32 1.0, %v2828_v0 }
 0x96d   :  { %2829 = vrcp.f32 %v2115_v26 }
 0x96e   :  { %2831 = vrcp.f32 %v2116_v16 }
 0x977   :  { %v2830_v47 = vpop.eup %2829 }
 0x978   :  { %v2832_v14 = vpop.eup %2831  ;;  %v2121_v62 = vmul.f32 %v2830_v47, %v2101_v21 }
 0x979   :  { %v2122_v58 = vmul.f32 %v2832_v14, %v2103_v59 }
 0x97a   :  { %v2155_v46 = vpack.c.bf16 %v2121_v62, %v2121_v62 }
 0x97b   :  { %v2156_v23 = vpack.c.bf16 %v2122_v58, %v2122_v58 }
 0x97d   :  { %2289 = vmatprep.mubr.bf16.mxu0 %v2156_v23 }
 0x97e   :  { %2290 = vmatmul.mubr.bf16.vlgmr.msra.gmra.mrb[32].mxu0 %v2155_v46 }
 0xa51   :  { %v2531_v20 = vpop.f32.mrb[32].mxu0 }
 0xa52   :  { %v2532_v32 = vpop.f32.mrb[33].mxu0 }
 0xa53   :  { %v2533_v45 = vadd.f32 %v2532_v32, %v2531_v20  ;;  %v2534_v5 = vpop.f32.mrb[34].mxu0 }
 0xa54   :  { %v2535_v10 = vpop.f32.mrb[35].mxu0 }
 0xa55   :  { %v2292_v48 = vadd.f32 %v2533_v45, %v2160_v22 }
 0xa57   :  { %v2297_v51 = vadd.f32 %v2292_v48, %v4290_v37 }
 0xa59   :  { %v2306_v13 = vpack.c.bf16 %v2297_v51, %v2297_v51 }
 0xa5b   :  { %2611 = vmatmul.mubr.msk.bf16.vlgmr.msra.gmra.mrb[40].mxu1 %vm369_vm0, %v2306_v13 }
 0xb2e   :  { %v2375_v1 = vpop.f32.mrb[40].mxu1 }
 0xb2f   :  { %v2376_v6 = vadd.f32 %v2480_v11, %v2375_v1  ;;  %v2612_v49 = vpop.f32.mrb[41].mxu1 }
 0xb30   :  { %v2378_v53 = vpop.f32.mrb[42].mxu1 }
 0xb31   :  { %2381 = vst [vmem:[#allocation23] sm:$0xff] %v2376_v6  ;;  %v2613_v29 = vpop.f32.mrb[43].mxu1 }
 0xb32   :  { %3132 = shalt.err (!%p3129_p10)
}
 0xb33   :  { %s3133_s27 = scalar_lea.hbm %s4338_s13, 128 }
 0xb34   :  { %p3134_p11 = scmp.ne.s32.totalorder %s4338_s13, %s3133_s27  ;;  %p3137_p12 = scmp.lt.u32.totalorder %s3133_s27, %s4338_s13 }
 0xb36   :  { %p3139_p13 = pnand %p3137_p12, %p3134_p11 }
 0xb38   :  { %3142 = shalt.err (!%p3139_p13)
}
 0xb39   :  { %2391 = dma.vmem_to_hbm [thread:$0]  %s2389_s19, 128, %s4338_s13, [#allocation4]  }
 0xb3a   :  { %3157 = dma.done.wait [#allocation4], 128  }
 0xb3b   :  { %3158 = vsyncadd [#allocation4], 4294967168 }
 0xb3c   :  { %2395 = vsyncpa [#allocation3], 1 }
 0xb3d   :  { %2396 = vsyncpa [#allocation6], 1 }
 0xb3e   :  { %2397 = vsyncpa [#allocation9], 1 }
 0xb3f   :  { %2398 = vsyncpa [#allocation12], 1 }
 0xb40   :  { %2399 = vsyncpa [#allocation15], 1 }
 0xb41   :  { %2400 = vsyncpa [#allocation18], 1 }
 0xb42   :  { %2401 = vsyncpa [#allocation21], 1 }
 0xb43   :  { %2402 = vsyncpa [#allocation4], 1 }

</bundles_post_ra>
